<compile_context>
chip_gen: v5e
topology: v5e:2x2
jax: 0.10.0
libtpu: 0.0.40
codegen_flags: <defaults>
</compile_context>

<pallas_src>
from functools import partial

import jax
import jax.numpy as jnp
from jax import lax
from jax.experimental import pallas as pl
from jax.experimental.pallas import tpu as pltpu


# --------------------------------------------------------------------------------------
# Pallas kernels
# --------------------------------------------------------------------------------------

def _encode1_kernel(p_ref, w_ref, b_ref, f_ref, m_ref):
    # Fused encoder for image1: one patch tile, ONE MXU matmul against the concatenated
    # (fmap | up_mask) weights (folded fnet + defom_f_align residual + normalization and
    # the up_mask head), bf16 operands, f32 accumulate; both outputs stored in bf16.
    nf = f_ref.shape[1]
    acc = jnp.dot(p_ref[...], w_ref[...], preferred_element_type=jnp.float32) + b_ref[...]
    f_ref[...] = acc[:, :nf].astype(f_ref.dtype)
    m_ref[...] = acc[:, nf:].astype(m_ref.dtype)


def _encode2_kernel(p_ref, w_ref, b_ref, f_ref):
    # Fused encoder for image2 (fmap only).
    acc = jnp.dot(p_ref[...], w_ref[...], preferred_element_type=jnp.float32) + b_ref[...]
    f_ref[...] = acc.astype(f_ref.dtype)


def _corr_disp_kernel(f1_ref, f2_ref, cost_ref, disp_ref, *, inv_sqrt_c):
    # Fused CorrBlock1D.corr + triangular mask + soft-argmax disparity.
    #   corr[h, w2, w1] = <fmap1[h, w1, :], fmap2[h, w2, :]> / sqrt(C), masked (w1 >= w2)
    # fmap1 is contracted on C in its natural layout (no HBM pre-transpose); h is the MXU
    # batch dim.  The whole tile is written with a single dense store (h-major layout);
    # the torch-layout permute happens in the wrapper.
    # TODO(synk): optionally skip W1 blocks strictly above the diagonal (half the MXU work).
    f1 = f1_ref[0]                      # (th, W1, C) bf16
    f2 = f2_ref[0]                      # (th, W2, C) bf16
    W1 = f1.shape[1]
    W2 = f2.shape[1]
    corr = jnp.einsum('hxc,hyc->hxy', f2, f1,
                      preferred_element_type=jnp.float32) * inv_sqrt_c   # (th, W2, W1)
    w2i = lax.broadcasted_iota(jnp.int32, (1, W2, W1), 1)
    w1i = lax.broadcasted_iota(jnp.int32, (1, W2, W1), 2)
    valid = w1i >= w2i
    # triangular-masked cost volume, ONE dense full-block store (bf16)
    cost_ref[0] = jnp.where(valid, corr, 0.0).astype(cost_ref.dtype)
    # soft-argmax over candidate w2 (f32 math, exact division for parity)
    logits = jnp.where(valid, corr, -1e9)
    rel = (w1i - w2i).astype(jnp.float32)
    m = jnp.max(logits, axis=1, keepdims=True)           # (th, 1, W1)
    e = jnp.exp(logits - m)
    den = jnp.sum(e, axis=1, keepdims=True)
    num = jnp.sum(e * rel, axis=1, keepdims=True)
    disp_ref[0] = num / den                              # (th, 1, W1), stored once


def _convex_upsample_kernel(nb_ref, mask_ref, o_ref, *, factor):
    # upsample_flow semantics: softmax over the 9 taps of the 3x3 neighborhood, convex
    # combination of (factor * flow) taps for every (factor x factor) sub-pixel position.
    # Lane-dense layout: the last axis is Wc*factor^2; taps are the leading axis, so the
    # 9-way softmax is pure elementwise VPU work and the store is one dense block.
    m = mask_ref[0].astype(jnp.float32)    # (9, th, WF)
    nb = nb_ref[0]                         # (9, th, WF) f32, taps pre-replicated over FF
    mmax = jnp.max(m, axis=0, keepdims=True)
    e = jnp.exp(m - mmax)
    den = jnp.sum(e, axis=0)               # (th, WF)
    num = jnp.sum(e * nb, axis=0)          # (th, WF)
    o_ref[0] = (float(factor) * num) / den


# --------------------------------------------------------------------------------------
# Tile-size helpers (conservative so default scoped-VMEM limits hold on v5e/v6e/v7x)
# --------------------------------------------------------------------------------------

def _round_up(x, mult):
    return ((x + mult - 1) // mult) * mult


def _pick_tm(m_rows):
    # Large M tile per perf review: fewer grid steps / longer DMA bursts, still small VMEM.
    return m_rows if m_rows <= 2048 else 2048


def _pick_th_corr(hcp, w1, w2, c, cost_bytes):
    # Rows of H per corr tile. hcp is a multiple of 8; keep the double-buffered blocks
    # plus f32 intermediates under ~10 MiB so it fits v5e's 16 MiB default scoped VMEM
    # and leaves ample headroom on v7x's 64 MiB physical VMEM.
    budget = 10 << 20
    best = 8
    for th in (8, 16, 32):
        if th > hcp or hcp % th:
            continue
        blocks = th * (w1 * c * 2 + w2 * c * 2 + w2 * w1 * cost_bytes + 4 * w1)
        interm = 2 * th * w2 * w1 * 4
        if 2 * blocks + interm <= budget:
            best = th
    return min(best, hcp)


# --------------------------------------------------------------------------------------
# pallas_call wrappers
# --------------------------------------------------------------------------------------

_VMEM_LIMIT = 32 * 1024 * 1024   # safe on v5e (128 MiB phys), v6e (128 MiB), v7x (64 MiB)


def _encode_image1(p, w_cat, b_cat, nf_pad, nm_pad):
    M, K = p.shape
    ncat = nf_pad + nm_pad
    tm = _pick_tm(M)
    Mp = pl.cdiv(M, tm) * tm
    if Mp != M:
        p = jnp.pad(p, ((0, Mp - M), (0, 0)))
    f, m = pl.pallas_call(
        _encode1_kernel,
        out_shape=(jax.ShapeDtypeStruct((Mp, nf_pad), jnp.bfloat16),
                   jax.ShapeDtypeStruct((Mp, nm_pad), jnp.bfloat16)),
        grid=(Mp // tm,),
        in_specs=[pl.BlockSpec((tm, K), lambda i: (i, 0)),
                  pl.BlockSpec((K, ncat), lambda i: (0, 0)),
                  pl.BlockSpec((1, ncat), lambda i: (0, 0))],
        out_specs=(pl.BlockSpec((tm, nf_pad), lambda i: (i, 0)),
                   pl.BlockSpec((tm, nm_pad), lambda i: (i, 0))),
        compiler_params=pltpu.CompilerParams(
            dimension_semantics=("parallel",),
            vmem_limit_bytes=_VMEM_LIMIT),
    )(p, w_cat, b_cat)
    return f[:M], m[:M]


def _encode_image2(p, wf, bf):
    M, K = p.shape
    Nf = wf.shape[1]
    tm = _pick_tm(M)
    Mp = pl.cdiv(M, tm) * tm
    if Mp != M:
        p = jnp.pad(p, ((0, Mp - M), (0, 0)))
    f = pl.pallas_call(
        _encode2_kernel,
        out_shape=jax.ShapeDtypeStruct((Mp, Nf), jnp.bfloat16),
        grid=(Mp // tm,),
        in_specs=[pl.BlockSpec((tm, K), lambda i: (i, 0)),
                  pl.BlockSpec((K, Nf), lambda i: (0, 0)),
                  pl.BlockSpec((1, Nf), lambda i: (0, 0))],
        out_specs=pl.BlockSpec((tm, Nf), lambda i: (i, 0)),
        compiler_params=pltpu.CompilerParams(
            dimension_semantics=("parallel",),
            vmem_limit_bytes=_VMEM_LIMIT),
    )(p, wf, bf)
    return f[:M]


def _corr_softargmax(f1, f2, *, true_c, cost_dtype):
    # f1: (B, Hcp, W1, C) bf16 natural layout; f2: (B, Hcp, W2, C) bf16 natural layout.
    B, Hcp, W1, C = f1.shape
    W2 = f2.shape[2]
    th = _pick_th_corr(Hcp, W1, W2, C, jnp.dtype(cost_dtype).itemsize)
    inv_sqrt_c = 1.0 / (float(true_c) ** 0.5)
    cost, disp = pl.pallas_call(
        partial(_corr_disp_kernel, inv_sqrt_c=inv_sqrt_c),
        out_shape=(jax.ShapeDtypeStruct((B, Hcp, W2, W1), cost_dtype),
                   jax.ShapeDtypeStruct((B, Hcp, 1, W1), jnp.float32)),
        grid=(B, Hcp // th),
        in_specs=[pl.BlockSpec((1, th, W1, C), lambda b, h: (b, h, 0, 0)),
                  pl.BlockSpec((1, th, W2, C), lambda b, h: (b, h, 0, 0))],
        out_specs=(pl.BlockSpec((1, th, W2, W1), lambda b, h: (b, h, 0, 0)),
                   pl.BlockSpec((1, th, 1, W1), lambda b, h: (b, h, 0, 0))),
        compiler_params=pltpu.CompilerParams(
            dimension_semantics=("parallel", "parallel"),
            vmem_limit_bytes=_VMEM_LIMIT),
    )(f1, f2)
    return cost, disp


def _convex_upsample(nb_tap, mask_tap, factor):
    # nb_tap:   (B, 9, Hcp, Wc*FF) f32  (3x3 taps, replicated over the FF sub-pixels)
    # mask_tap: (B, 9, Hcp, Wc*FF) bf16 (tap-major, lane-dense)
    B, _, Hcp, WF = nb_tap.shape
    th = 8
    return pl.pallas_call(
        partial(_convex_upsample_kernel, factor=factor),
        out_shape=jax.ShapeDtypeStruct((B, Hcp, WF), jnp.float32),
        grid=(B, Hcp // th),
        in_specs=[pl.BlockSpec((1, 9, th, WF), lambda b, h: (b, 0, h, 0)),
                  pl.BlockSpec((1, 9, th, WF), lambda b, h: (b, 0, h, 0))],
        out_specs=pl.BlockSpec((1, th, WF), lambda b, h: (b, h, 0)),
        compiler_params=pltpu.CompilerParams(
            dimension_semantics=("parallel", "parallel"),
            vmem_limit_bytes=_VMEM_LIMIT),
    )(nb_tap, mask_tap)


# --------------------------------------------------------------------------------------
# Glue (reshapes / parameter folding) in plain JAX
# --------------------------------------------------------------------------------------

def _patches(img, factor, k_pad):
    # 4x4 non-overlapping patches -> rows of a matmul (stand-in feature extraction glue);
    # K padded to an MXU-friendly multiple of 128, operands cast to bf16.
    B, H, W, C = img.shape
    Hc, Wc = H // factor, W // factor
    p = img.astype(jnp.float32).reshape(B, Hc, factor, Wc, factor, C)
    p = p.transpose(0, 1, 3, 2, 4, 5).reshape(B * Hc * Wc, factor * factor * C)
    K = p.shape[1]
    if K < k_pad:
        p = jnp.pad(p, ((0, 0), (0, k_pad - K)))
    return p.astype(jnp.bfloat16)


def _unfold3x3(flow):
    # glue: F.unfold(flow, [3,3], padding=1) neighbor gather (kh-major tap order);
    # the softmax / convex combination stays inside the Pallas kernel.
    B, H, W = flow.shape
    fp = jnp.pad(flow, ((0, 0), (1, 1), (1, 1)))
    taps = [fp[:, kh:kh + H, kw:kw + W] for kh in range(3) for kw in range(3)]
    return jnp.stack(taps, axis=-1)   # (B, H, W, 9)


def _fold_encoder_params(params):
    # Trace-time algebraic folding (exact):
    #   fmap = fnet(p_norm) + defom_f_align(defom(p_norm))
    #        = p_norm @ (w_feat + w_defom @ w_align) + (b_feat + b_align + b_defom @ w_align)
    #   up_mask = fmap @ w_mask + b_mask   ->  folded through the same patch input
    #   p_norm = (2/255) p - 1             ->  folded into weights/bias
    # fmap and mask weights are concatenated into one lane-dense (K, Nf_pad + Nm_pad) RHS.
    # TODO(synk): bf16 folding of [0,255] pixels introduces small quantization vs f32 NCHW ref.
    w_enc = params['w_feat'] + params['w_defom'] @ params['w_align']
    b_enc = params['b_feat'] + params['b_align'] + params['b_defom'] @ params['w_align']
    w_msk = w_enc @ params['w_mask']
    b_msk = b_enc @ params['w_mask'] + params['b_mask']

    scale = 2.0 / 255.0
    b_enc = b_enc - jnp.sum(w_enc, axis=0, keepdims=True)
    b_msk = b_msk - jnp.sum(w_msk, axis=0, keepdims=True)
    w_enc = scale * w_enc
    w_msk = scale * w_msk

    c_fmap = w_enc.shape[1]
    n_mask = w_msk.shape[1]
    nf_pad = _round_up(c_fmap, 128)
    nm_pad = _round_up(n_mask, 128)
    K = w_enc.shape[0]
    k_pad = _round_up(K, 128)

    w_enc = jnp.pad(w_enc, ((0, k_pad - K), (0, nf_pad - c_fmap)))
    w_msk = jnp.pad(w_msk, ((0, k_pad - K), (0, nm_pad - n_mask)))
    b_enc = jnp.pad(b_enc, ((0, 0), (0, nf_pad - c_fmap)))
    b_msk = jnp.pad(b_msk, ((0, 0), (0, nm_pad - n_mask)))

    w_cat = jnp.concatenate([w_enc, w_msk], axis=1).astype(jnp.bfloat16)
    b_cat = jnp.concatenate([b_enc, b_msk], axis=1).astype(jnp.float32)
    return w_cat, b_cat, nf_pad, nm_pad, c_fmap, n_mask


def init_params(key, *, in_patch=48, c_fmap=256, c_defom=128, factor=4):
    ks = jax.random.split(key, 4)

    def w(k, shape, fan_in):
        return jax.random.normal(k, shape, jnp.float32) / jnp.sqrt(jnp.float32(fan_in))

    return {
        'w_feat': w(ks[0], (in_patch, c_fmap), in_patch),       # stand-in fnet projection
        'b_feat': jnp.zeros((1, c_fmap), jnp.float32),
        'w_defom': w(ks[1], (in_patch, c_defom), in_patch),     # stand-in DEFOM features
        'b_defom': jnp.zeros((1, c_defom), jnp.float32),
        'w_align': w(ks[2], (c_defom, c_fmap), c_defom),        # defom_f_align 1x1 conv
        'b_align': jnp.zeros((1, c_fmap), jnp.float32),
        'w_mask': w(ks[3], (c_fmap, 9 * factor * factor), c_fmap),   # up_mask head
        'b_mask': jnp.zeros((1, 9 * factor * factor), jnp.float32),
    }


def new_stereo_forward(image1, image2, params, factor=4, cost_dtype=jnp.bfloat16):
    # layout: NHWC images in [0, 255], shape (B, H, W, 3); features at 1/factor resolution.
    B, H, W, _ = image1.shape
    Hc, Wc = H // factor, W // factor
    FF = factor * factor

    # TODO(synk): MultiBasicEncoder / BasicEncoder / DefomEncoder (pretrained DINOv2) backbones
    # are not defined in the reference snippet; replaced by a deterministic 4x4 patch-projection
    # encoder. fnet + defom residual + up_mask head + image normalization are folded into one
    # concatenated bf16 projection matrix at trace time and run as a tiled Pallas MXU matmul.
    w_cat, b_cat, nf_pad, nm_pad, c_fmap, n_mask = _fold_encoder_params(params)
    Kp = w_cat.shape[0]

    p1 = _patches(image1, factor, Kp)
    p2 = _patches(image2, factor, Kp)

    f1_flat, mask_flat = _encode_image1(p1, w_cat, b_cat, nf_pad, nm_pad)   # fmap1 + up_mask
    f2_flat = _encode_image2(p2, w_cat[:, :nf_pad], b_cat[:, :nf_pad])      # fmap2

    fmap1 = f1_flat.reshape(B, Hc, Wc, nf_pad)            # bf16, natural layout
    fmap2 = f2_flat.reshape(B, Hc, Wc, nf_pad)            # bf16, natural layout

    # Pad the coarse H axis to a multiple of 8 so all corr / upsample tiles stay
    # (8,128)-friendly (no whole-Hc VMEM-busting fallback); padded rows are cropped.
    Hcp = max(8, _round_up(Hc, 8))
    ph = Hcp - Hc
    f1p = jnp.pad(fmap1, ((0, 0), (0, ph), (0, 0), (0, 0))) if ph else fmap1
    f2p = jnp.pad(fmap2, ((0, 0), (0, ph), (0, 0), (0, 0))) if ph else fmap2

    # Fused CorrBlock1D.corr + triangular mask + soft-argmax (one dense store per tile).
    # TODO(synk): NewCorrBlock1D lookup, BasicMultiUpdateBlock / ScaleBasicMultiUpdateBlock GRUs,
    # DisparityCompletor, DispGradPredictor, DispRefine, Lightfuse and HiddenstateUpdater are
    # undefined in the reference; disparity comes from a soft-argmax over the masked cost volume
    # instead of the iterative GRU refinement.
    cost_hmaj, disp_p = _corr_softargmax(f1p, f2p, true_c=c_fmap, cost_dtype=cost_dtype)
    # torch layout (B, W2, Hc, W1): the major<->sublane relayout is not expressible as an
    # in-register Mosaic transpose, so this cheap bf16 permute is delegated to XLA.
    cost_volume_full = jnp.transpose(cost_hmaj[:, :Hc], (0, 2, 1, 3))
    disp_q = disp_p[:, :Hc, 0, :]                         # (B, Hc, Wc)
    flow_q = -disp_q

    # up_mask head (bf16) -> tap-major, lane-dense (B, 9, Hc, Wc*FF) layout for the
    # convex-upsample kernel; 3x3 flow taps replicated across the FF sub-pixel lanes.
    up_mask = mask_flat[:, :n_mask].reshape(B, Hc, Wc, 9, FF)
    mask_tap = up_mask.transpose(0, 3, 1, 2, 4).reshape(B, 9, Hc, Wc * FF)
    nb = _unfold3x3(flow_q)                                        # (B, Hc, Wc, 9) f32
    nb_tap = jnp.repeat(nb.transpose(0, 3, 1, 2), FF, axis=-1)     # (B, 9, Hc, Wc*FF)
    if ph:
        mask_tap = jnp.pad(mask_tap, ((0, 0), (0, 0), (0, ph), (0, 0)))
        nb_tap = jnp.pad(nb_tap, ((0, 0), (0, 0), (0, ph), (0, 0)))

    up = _convex_upsample(nb_tap, mask_tap, factor)[:, :Hc]        # (B, Hc, Wc*FF) f32
    flow_up = up.reshape(B, Hc, Wc, factor, factor).transpose(
        0, 1, 3, 2, 4).reshape(B, H, W)

    return {
        'flow': jnp.minimum(flow_up, 0.0),      # torch.clip(flow_refine_up, max=0)
        'flow_q': jnp.minimum(flow_q, 0.0),     # torch.clip(flow_q_final, max=0)
        'cost_volume': cost_volume_full,        # (B, W2, Hc, W1), triangular-masked, bf16
        'fmap1': fmap1[..., :c_fmap],
    }


# --------------------------------------------------------------------------------------

if __name__ == "__main__":
    key = jax.random.PRNGKey(0)
    k1, k2, kp = jax.random.split(key, 3)
    B, H, W = 2, 32, 32                     # small example shapes, factor = 4 downsample
    image1 = jax.random.uniform(k1, (B, H, W, 3), jnp.float32, 0.0, 255.0)
    image2 = jax.random.uniform(k2, (B, H, W, 3), jnp.float32, 0.0, 255.0)
    params = init_params(kp)

    out = jax.jit(new_stereo_forward)(image1, image2, params)
    jax.block_until_ready(out)

    assert out['cost_volume'].shape == (B, W // 4, H // 4, W // 4)
    assert out['flow'].shape == (B, H, W)
    assert out['flow_q'].shape == (B, H // 4, W // 4)
    assert bool(jnp.isfinite(out['flow']).all())
    assert bool(jnp.isfinite(out['flow_q']).all())
    print("KERNEL_OK")
</pallas_src>

<mosaic_0001>
module attributes {stable_mosaic.version = 11 : i64} {
  func.func @_encode1_kernel(%arg0: i32, %arg1: memref<128x128xbf16, #tpu.memory_space<vmem>>, %arg2: memref<128x512xbf16, #tpu.memory_space<vmem>>, %arg3: memref<1x512xf32, #tpu.memory_space<vmem>>, %arg4: memref<128x256xbf16, #tpu.memory_space<vmem>>, %arg5: memref<128x256xbf16, #tpu.memory_space<vmem>>) attributes {dimension_semantics = [#tpu.dimension_semantics<parallel>], iteration_bounds = array<i64: 1>, scalar_prefetch = 0 : i64, scratch_operands = 0 : i64, tpu.core_type = #tpu.core_type<tc>, window_params = [{transform_indices = @transform_0, window_bounds = array<i64: 128, 128>}, {pipeline_mode = #tpu.pipeline_mode<synchronous>, transform_indices = @transform_1, window_bounds = array<i64: 128, 512>}, {pipeline_mode = #tpu.pipeline_mode<synchronous>, transform_indices = @transform_2, window_bounds = array<i64: 1, 512>}, {transform_indices = @transform_3, window_bounds = array<i64: 128, 256>}, {transform_indices = @transform_4, window_bounds = array<i64: 128, 256>}]} {
    %c0 = arith.constant 0 : index
    %c0_0 = arith.constant 0 : index
    %0 = vector.load %arg1[%c0, %c0_0] : memref<128x128xbf16, #tpu.memory_space<vmem>>, vector<128x128xbf16>
    %c0_1 = arith.constant 0 : index
    %c0_2 = arith.constant 0 : index
    %1 = vector.load %arg2[%c0_1, %c0_2] : memref<128x512xbf16, #tpu.memory_space<vmem>>, vector<128x512xbf16>
    %cst = arith.constant dense<0.000000e+00> : vector<128x512xf32>
    %2 = tpu.matmul %0, %1, %cst {dimension_numbers = #tpu.dot_dimension_numbers<[1], [0], [0], [1], [0, 0, 1, 1], [], []>} : vector<128x128xbf16>, vector<128x512xbf16>, vector<128x512xf32> -> vector<128x512xf32>
    %c0_3 = arith.constant 0 : index
    %c0_4 = arith.constant 0 : index
    %3 = vector.load %arg3[%c0_3, %c0_4] : memref<1x512xf32, #tpu.memory_space<vmem>>, vector<1x512xf32>
    %4 = vector.broadcast %3 : vector<1x512xf32> to vector<128x512xf32>
    %5 = arith.addf %2, %4 : vector<128x512xf32>
    %6 = vector.extract_strided_slice %5 {offsets = [0, 0], sizes = [128, 256], strides = [1, 1]} : vector<128x512xf32> to vector<128x256xf32>
    %7 = arith.truncf %6 : vector<128x256xf32> to vector<128x256xbf16>
    %c0_5 = arith.constant 0 : index
    %c0_6 = arith.constant 0 : index
    %8 = vector.load %arg4[%c0_5, %c0_6] : memref<128x256xbf16, #tpu.memory_space<vmem>>, vector<128x256xbf16>
    tpu.vector_store %arg4[%c0_5, %c0_6], %7 {strides = array<i32>} : memref<128x256xbf16, #tpu.memory_space<vmem>>, vector<128x256xbf16>,
    %9 = vector.extract_strided_slice %5 {offsets = [0, 256], sizes = [128, 256], strides = [1, 1]} : vector<128x512xf32> to vector<128x256xf32>
    %10 = arith.truncf %9 : vector<128x256xf32> to vector<128x256xbf16>
    %c0_7 = arith.constant 0 : index
    %c0_8 = arith.constant 0 : index
    %11 = vector.load %arg5[%c0_7, %c0_8] : memref<128x256xbf16, #tpu.memory_space<vmem>>, vector<128x256xbf16>
    tpu.vector_store %arg5[%c0_7, %c0_8], %10 {strides = array<i32>} : memref<128x256xbf16, #tpu.memory_space<vmem>>, vector<128x256xbf16>,
    return
  }
  func.func @transform_0(%arg0: i32) -> (i32, i32) {
    %c0_i32 = arith.constant 0 : i32
    %c0_i32_0 = arith.constant 0 : i32
    return %arg0, %c0_i32 : i32, i32
  }
  func.func @transform_1(%arg0: i32) -> (i32, i32) {
    %c0_i32 = arith.constant 0 : i32
    %c0_i32_0 = arith.constant 0 : i32
    %c0_i32_1 = arith.constant 0 : i32
    return %c0_i32, %c0_i32_0 : i32, i32
  }
  func.func @transform_2(%arg0: i32) -> (i32, i32) {
    %c0_i32 = arith.constant 0 : i32
    %c0_i32_0 = arith.constant 0 : i32
    %c0_i32_1 = arith.constant 0 : i32
    return %c0_i32, %c0_i32_0 : i32, i32
  }
  func.func @transform_3(%arg0: i32) -> (i32, i32) {
    %c0_i32 = arith.constant 0 : i32
    %c0_i32_0 = arith.constant 0 : i32
    return %arg0, %c0_i32 : i32, i32
  }
  func.func @transform_4(%arg0: i32) -> (i32, i32) {
    %c0_i32 = arith.constant 0 : i32
    %c0_i32_0 = arith.constant 0 : i32
    return %arg0, %c0_i32 : i32, i32
  }
}

module attributes {stable_mosaic.version = 11 : i64} {
  func.func @_encode2_kernel(%arg0: i32, %arg1: memref<128x128xbf16, #tpu.memory_space<vmem>>, %arg2: memref<128x256xbf16, #tpu.memory_space<vmem>>, %arg3: memref<1x256xf32, #tpu.memory_space<vmem>>, %arg4: memref<128x256xbf16, #tpu.memory_space<vmem>>) attributes {dimension_semantics = [#tpu.dimension_semantics<parallel>], iteration_bounds = array<i64: 1>, scalar_prefetch = 0 : i64, scratch_operands = 0 : i64, tpu.core_type = #tpu.core_type<tc>, window_params = [{transform_indices = @transform_0, window_bounds = array<i64: 128, 128>}, {pipeline_mode = #tpu.pipeline_mode<synchronous>, transform_indices = @transform_1, window_bounds = array<i64: 128, 256>}, {pipeline_mode = #tpu.pipeline_mode<synchronous>, transform_indices = @transform_2, window_bounds = array<i64: 1, 256>}, {transform_indices = @transform_3, window_bounds = array<i64: 128, 256>}]} {
    %c0 = arith.constant 0 : index
    %c0_0 = arith.constant 0 : index
    %0 = vector.load %arg1[%c0, %c0_0] : memref<128x128xbf16, #tpu.memory_space<vmem>>, vector<128x128xbf16>
    %c0_1 = arith.constant 0 : index
    %c0_2 = arith.constant 0 : index
    %1 = vector.load %arg2[%c0_1, %c0_2] : memref<128x256xbf16, #tpu.memory_space<vmem>>, vector<128x256xbf16>
    %cst = arith.constant dense<0.000000e+00> : vector<128x256xf32>
    %2 = tpu.matmul %0, %1, %cst {dimension_numbers = #tpu.dot_dimension_numbers<[1], [0], [0], [1], [0, 0, 1, 1], [], []>} : vector<128x128xbf16>, vector<128x256xbf16>, vector<128x256xf32> -> vector<128x256xf32>
    %c0_3 = arith.constant 0 : index
    %c0_4 = arith.constant 0 : index
    %3 = vector.load %arg3[%c0_3, %c0_4] : memref<1x256xf32, #tpu.memory_space<vmem>>, vector<1x256xf32>
    %4 = vector.broadcast %3 : vector<1x256xf32> to vector<128x256xf32>
    %5 = arith.addf %2, %4 : vector<128x256xf32>
    %6 = arith.truncf %5 : vector<128x256xf32> to vector<128x256xbf16>
    %c0_5 = arith.constant 0 : index
    %c0_6 = arith.constant 0 : index
    %7 = vector.load %arg4[%c0_5, %c0_6] : memref<128x256xbf16, #tpu.memory_space<vmem>>, vector<128x256xbf16>
    tpu.vector_store %arg4[%c0_5, %c0_6], %6 {strides = array<i32>} : memref<128x256xbf16, #tpu.memory_space<vmem>>, vector<128x256xbf16>,
    return
  }
  func.func @transform_0(%arg0: i32) -> (i32, i32) {
    %c0_i32 = arith.constant 0 : i32
    %c0_i32_0 = arith.constant 0 : i32
    return %arg0, %c0_i32 : i32, i32
  }
  func.func @transform_1(%arg0: i32) -> (i32, i32) {
    %c0_i32 = arith.constant 0 : i32
    %c0_i32_0 = arith.constant 0 : i32
    %c0_i32_1 = arith.constant 0 : i32
    return %c0_i32, %c0_i32_0 : i32, i32
  }
  func.func @transform_2(%arg0: i32) -> (i32, i32) {
    %c0_i32 = arith.constant 0 : i32
    %c0_i32_0 = arith.constant 0 : i32
    %c0_i32_1 = arith.constant 0 : i32
    return %c0_i32, %c0_i32_0 : i32, i32
  }
  func.func @transform_3(%arg0: i32) -> (i32, i32) {
    %c0_i32 = arith.constant 0 : i32
    %c0_i32_0 = arith.constant 0 : i32
    return %arg0, %c0_i32 : i32, i32
  }
}

module attributes {stable_mosaic.version = 11 : i64} {
  func.func @_corr_disp_kernel(%arg0: i32, %arg1: i32, %arg2: memref<1x8x8x256xbf16, #tpu.memory_space<vmem>>, %arg3: memref<1x8x8x256xbf16, #tpu.memory_space<vmem>>, %arg4: memref<1x8x8x8xbf16, #tpu.memory_space<vmem>>, %arg5: memref<1x8x1x8xf32, #tpu.memory_space<vmem>>) attributes {dimension_semantics = [#tpu.dimension_semantics<parallel>, #tpu.dimension_semantics<parallel>], iteration_bounds = array<i64: 2, 1>, scalar_prefetch = 0 : i64, scratch_operands = 0 : i64, tpu.core_type = #tpu.core_type<tc>, window_params = [{transform_indices = @transform_0, window_bounds = array<i64: 1, 8, 8, 256>}, {transform_indices = @transform_1, window_bounds = array<i64: 1, 8, 8, 256>}, {transform_indices = @transform_2, window_bounds = array<i64: 1, 8, 8, 8>}, {transform_indices = @transform_3, window_bounds = array<i64: 1, 8, 1, 8>}]} {
    %c0 = arith.constant 0 : index
    %c0_0 = arith.constant 0 : index
    %c0_1 = arith.constant 0 : index
    %c0_2 = arith.constant 0 : index
    %0 = vector.load %arg2[%c0, %c0_0, %c0_1, %c0_2] : memref<1x8x8x256xbf16, #tpu.memory_space<vmem>>, vector<1x8x8x256xbf16>
    %1 = vector.shape_cast %0 : vector<1x8x8x256xbf16> to vector<8x8x256xbf16>
    %c0_3 = arith.constant 0 : index
    %c0_4 = arith.constant 0 : index
    %c0_5 = arith.constant 0 : index
    %c0_6 = arith.constant 0 : index
    %2 = vector.load %arg3[%c0_3, %c0_4, %c0_5, %c0_6] : memref<1x8x8x256xbf16, #tpu.memory_space<vmem>>, vector<1x8x8x256xbf16>
    %3 = vector.shape_cast %2 : vector<1x8x8x256xbf16> to vector<8x8x256xbf16>
    "tpu.trace_start"() <{level = 10 : i32, message = "hxc,hyc->hxy"}> : () -> ()
    %cst = arith.constant dense<0.000000e+00> : vector<8x8x8xf32>
    %4 = tpu.matmul %3, %1, %cst {dimension_numbers = #tpu.dot_dimension_numbers<[2], [2], [1], [1], [0, 0, 0, 1, 1, 1], [0], [0]>} : vector<8x8x256xbf16>, vector<8x8x256xbf16>, vector<8x8x8xf32> -> vector<8x8x8xf32>
    "tpu.trace_stop"() : () -> ()
    %cst_7 = arith.constant 6.250000e-02 : f32
    %5 = vector.broadcast %cst_7 : f32 to vector<8x8x8xf32>
    %6 = arith.mulf %4, %5 : vector<8x8x8xf32>
    %7 = tpu.iota {dimensions = array<i32: 1>} : vector<1x8x8xi32>
    %8 = tpu.iota {dimensions = array<i32: 2>} : vector<1x8x8xi32>
    %9 = arith.cmpi sge, %8, %7 : vector<1x8x8xi32>
    %cst_8 = arith.constant 0.000000e+00 : f32
    %10 = vector.shape_cast %9 : vector<1x8x8xi1> to vector<1x8x8xi1>
    %11 = vector.broadcast %10 : vector<1x8x8xi1> to vector<8x8x8xi1>
    %12 = vector.broadcast %cst_8 : f32 to vector<8x8x8xf32>
    %13 = arith.select %11, %6, %12 : vector<8x8x8xi1>, vector<8x8x8xf32>
    %14 = arith.truncf %13 : vector<8x8x8xf32> to vector<8x8x8xbf16>
    %c0_9 = arith.constant 0 : index
    %c0_10 = arith.constant 0 : index
    %c0_11 = arith.constant 0 : index
    %c0_12 = arith.constant 0 : index
    %15 = vector.load %arg4[%c0_9, %c0_10, %c0_11, %c0_12] : memref<1x8x8x8xbf16, #tpu.memory_space<vmem>>, vector<1x8x8x8xbf16>
    %16 = vector.shape_cast %15 : vector<1x8x8x8xbf16> to vector<8x8x8xbf16>
    %17 = vector.shape_cast %14 : vector<8x8x8xbf16> to vector<1x8x8x8xbf16>
    tpu.vector_store %arg4[%c0_9, %c0_10, %c0_11, %c0_12], %17 {strides = array<i32>} : memref<1x8x8x8xbf16, #tpu.memory_space<vmem>>, vector<1x8x8x8xbf16>,
    %cst_13 = arith.constant -1.000000e+09 : f32
    %18 = vector.shape_cast %9 : vector<1x8x8xi1> to vector<1x8x8xi1>
    %19 = vector.broadcast %18 : vector<1x8x8xi1> to vector<8x8x8xi1>
    %20 = vector.broadcast %cst_13 : f32 to vector<8x8x8xf32>
    %21 = arith.select %19, %6, %20 : vector<8x8x8xi1>, vector<8x8x8xf32>
    %22 = arith.subi %8, %7 : vector<1x8x8xi32>
    %23 = arith.sitofp %22 : vector<1x8x8xi32> to vector<1x8x8xf32>
    %cst_14 = arith.constant dense<0xFF800000> : vector<8x8xf32>
    %24 = vector.multi_reduction <maximumf>, %21, %cst_14 [1] : vector<8x8x8xf32> to vector<8x8xf32>
    %25 = vector.shape_cast %24 : vector<8x8xf32> to vector<8x1x8xf32>
    %26 = vector.broadcast %25 : vector<8x1x8xf32> to vector<8x8x8xf32>
    %27 = arith.subf %21, %26 : vector<8x8x8xf32>
    %28 = math.exp %27 : vector<8x8x8xf32>
    %cst_15 = arith.constant dense<0.000000e+00> : vector<8x8xf32>
    %29 = vector.multi_reduction <add>, %28, %cst_15 [1] : vector<8x8x8xf32> to vector<8x8xf32>
    %30 = vector.shape_cast %29 : vector<8x8xf32> to vector<8x1x8xf32>
    %31 = vector.broadcast %23 : vector<1x8x8xf32> to vector<8x8x8xf32>
    %32 = arith.mulf %28, %31 : vector<8x8x8xf32>
    %cst_16 = arith.constant dense<0.000000e+00> : vector<8x8xf32>
    %33 = vector.multi_reduction <add>, %32, %cst_16 [1] : vector<8x8x8xf32> to vector<8x8xf32>
    %34 = vector.shape_cast %33 : vector<8x8xf32> to vector<8x1x8xf32>
    %35 = arith.divf %34, %30 : vector<8x1x8xf32>
    %c0_17 = arith.constant 0 : index
    %c0_18 = arith.constant 0 : index
    %c0_19 = arith.constant 0 : index
    %c0_20 = arith.constant 0 : index
    %36 = vector.load %arg5[%c0_17, %c0_18, %c0_19, %c0_20] : memref<1x8x1x8xf32, #tpu.memory_space<vmem>>, vector<1x8x1x8xf32>
    %37 = vector.shape_cast %36 : vector<1x8x1x8xf32> to vector<8x1x8xf32>
    %38 = vector.shape_cast %35 : vector<8x1x8xf32> to vector<1x8x1x8xf32>
    tpu.vector_store %arg5[%c0_17, %c0_18, %c0_19, %c0_20], %38 {strides = array<i32>} : memref<1x8x1x8xf32, #tpu.memory_space<vmem>>, vector<1x8x1x8xf32>,
    return
  }
  func.func @transform_0(%arg0: i32, %arg1: i32) -> (i32, i32, i32, i32) {
    %c0_i32 = arith.constant 0 : i32
    %c0_i32_0 = arith.constant 0 : i32
    %c0_i32_1 = arith.constant 0 : i32
    return %arg0, %arg1, %c0_i32, %c0_i32_0 : i32, i32, i32, i32
  }
  func.func @transform_1(%arg0: i32, %arg1: i32) -> (i32, i32, i32, i32) {
    %c0_i32 = arith.constant 0 : i32
    %c0_i32_0 = arith.constant 0 : i32
    %c0_i32_1 = arith.constant 0 : i32
    return %arg0, %arg1, %c0_i32, %c0_i32_0 : i32, i32, i32, i32
  }
  func.func @transform_2(%arg0: i32, %arg1: i32) -> (i32, i32, i32, i32) {
    %c0_i32 = arith.constant 0 : i32
    %c0_i32_0 = arith.constant 0 : i32
    %c0_i32_1 = arith.constant 0 : i32
    return %arg0, %arg1, %c0_i32, %c0_i32_0 : i32, i32, i32, i32
  }
  func.func @transform_3(%arg0: i32, %arg1: i32) -> (i32, i32, i32, i32) {
    %c0_i32 = arith.constant 0 : i32
    %c0_i32_0 = arith.constant 0 : i32
    %c0_i32_1 = arith.constant 0 : i32
    return %arg0, %arg1, %c0_i32, %c0_i32_0 : i32, i32, i32, i32
  }
}

module attributes {stable_mosaic.version = 11 : i64} {
  func.func @_convex_upsample_kernel(%arg0: i32, %arg1: i32, %arg2: memref<1x9x8x128xf32, #tpu.memory_space<vmem>>, %arg3: memref<1x9x8x128xbf16, #tpu.memory_space<vmem>>, %arg4: memref<1x8x128xf32, #tpu.memory_space<vmem>>) attributes {dimension_semantics = [#tpu.dimension_semantics<parallel>, #tpu.dimension_semantics<parallel>], iteration_bounds = array<i64: 2, 1>, scalar_prefetch = 0 : i64, scratch_operands = 0 : i64, tpu.core_type = #tpu.core_type<tc>, window_params = [{transform_indices = @transform_0, window_bounds = array<i64: 1, 9, 8, 128>}, {transform_indices = @transform_1, window_bounds = array<i64: 1, 9, 8, 128>}, {transform_indices = @transform_2, window_bounds = array<i64: 1, 8, 128>}]} {
    %c0 = arith.constant 0 : index
    %c0_0 = arith.constant 0 : index
    %c0_1 = arith.constant 0 : index
    %c0_2 = arith.constant 0 : index
    %0 = vector.load %arg3[%c0, %c0_0, %c0_1, %c0_2] : memref<1x9x8x128xbf16, #tpu.memory_space<vmem>>, vector<1x9x8x128xbf16>
    %1 = vector.shape_cast %0 : vector<1x9x8x128xbf16> to vector<9x8x128xbf16>
    %2 = arith.extf %1 : vector<9x8x128xbf16> to vector<9x8x128xf32>
    %c0_3 = arith.constant 0 : index
    %c0_4 = arith.constant 0 : index
    %c0_5 = arith.constant 0 : index
    %c0_6 = arith.constant 0 : index
    %3 = vector.load %arg2[%c0_3, %c0_4, %c0_5, %c0_6] : memref<1x9x8x128xf32, #tpu.memory_space<vmem>>, vector<1x9x8x128xf32>
    %4 = vector.shape_cast %3 : vector<1x9x8x128xf32> to vector<9x8x128xf32>
    %cst = arith.constant dense<0xFF800000> : vector<8x128xf32>
    %5 = vector.multi_reduction <maximumf>, %2, %cst [0] : vector<9x8x128xf32> to vector<8x128xf32>
    %6 = vector.shape_cast %5 : vector<8x128xf32> to vector<1x8x128xf32>
    %7 = vector.broadcast %6 : vector<1x8x128xf32> to vector<9x8x128xf32>
    %8 = arith.subf %2, %7 : vector<9x8x128xf32>
    %9 = math.exp %8 : vector<9x8x128xf32>
    %cst_7 = arith.constant dense<0.000000e+00> : vector<8x128xf32>
    %10 = vector.multi_reduction <add>, %9, %cst_7 [0] : vector<9x8x128xf32> to vector<8x128xf32>
    %11 = arith.mulf %9, %4 : vector<9x8x128xf32>
    %cst_8 = arith.constant dense<0.000000e+00> : vector<8x128xf32>
    %12 = vector.multi_reduction <add>, %11, %cst_8 [0] : vector<9x8x128xf32> to vector<8x128xf32>
    %cst_9 = arith.constant 4.000000e+00 : f32
    %13 = vector.broadcast %cst_9 : f32 to vector<8x128xf32>
    %14 = arith.mulf %13, %12 : vector<8x128xf32>
    %15 = arith.divf %14, %10 : vector<8x128xf32>
    %c0_10 = arith.constant 0 : index
    %c0_11 = arith.constant 0 : index
    %c0_12 = arith.constant 0 : index
    %16 = vector.load %arg4[%c0_10, %c0_11, %c0_12] : memref<1x8x128xf32, #tpu.memory_space<vmem>>, vector<1x8x128xf32>
    %17 = vector.shape_cast %16 : vector<1x8x128xf32> to vector<8x128xf32>
    %18 = vector.shape_cast %15 : vector<8x128xf32> to vector<1x8x128xf32>
    tpu.vector_store %arg4[%c0_10, %c0_11, %c0_12], %18 {strides = array<i32>} : memref<1x8x128xf32, #tpu.memory_space<vmem>>, vector<1x8x128xf32>,
    return
  }
  func.func @transform_0(%arg0: i32, %arg1: i32) -> (i32, i32, i32, i32) {
    %c0_i32 = arith.constant 0 : i32
    %c0_i32_0 = arith.constant 0 : i32
    %c0_i32_1 = arith.constant 0 : i32
    return %arg0, %c0_i32, %arg1, %c0_i32_0 : i32, i32, i32, i32
  }
  func.func @transform_1(%arg0: i32, %arg1: i32) -> (i32, i32, i32, i32) {
    %c0_i32 = arith.constant 0 : i32
    %c0_i32_0 = arith.constant 0 : i32
    %c0_i32_1 = arith.constant 0 : i32
    return %arg0, %c0_i32, %arg1, %c0_i32_0 : i32, i32, i32, i32
  }
  func.func @transform_2(%arg0: i32, %arg1: i32) -> (i32, i32, i32) {
    %c0_i32 = arith.constant 0 : i32
    %c0_i32_0 = arith.constant 0 : i32
    return %arg0, %arg1, %c0_i32 : i32, i32, i32
  }
}

</mosaic_0001>

<bundles_post_ra>
// kernel: neg.2
= control target key start
LH: loop header
LB: loop body
LE: loop exit
PB: predicated region body
PF: predicated region fallthrough
CT: control target
= control target key end

     0   :  { %s264_s0 = inlined_call_operand.vmem [shape: f32[2,8,1,8], index: 0, kind: input, shape index: {}]   ;;  %s265_s1 = inlined_call_operand.vmem [shape: f32[2,8,1,8], index: 1, kind: output, shape index: {}]  }
   0x1   :  { %v2_v0 = vld [vmem:[%s264_s0] sm:$0x1]  ;;  %v128_v1 = vld [vmem:[%s264_s0 + $0x8] sm:$0x1]  ;;  %v130_v2 = vld [vmem:[%s264_s0 + $0x1] sm:$0x1] }
   0x2   :  { %v5_v3 = vxor.u32 2147483648, %v2_v0  ;;  %v12_v4 = vxor.u32 2147483648, %v128_v1  ;;  %v20_v5 = vxor.u32 2147483648, %v130_v2  ;;  %v132_v6 = vld [vmem:[%s264_s0 + $0x9] sm:$0x1] }
   0x3   :  { %v28_v7 = vxor.u32 2147483648, %v132_v6  ;;  %v134_v8 = vld [vmem:[%s264_s0 + $0x2] sm:$0x1]  ;;  %v136_v9 = vld [vmem:[%s264_s0 + $0xa] sm:$0x1] }
   0x4   :  { %7 = vst [vmem:[%s265_s1] sm:$0x1] %v5_v3  ;;  %v36_v10 = vxor.u32 2147483648, %v134_v8  ;;  %v138_v11 = vld [vmem:[%s264_s0 + $0x3] sm:$0x1]  ;;  %v44_v12 = vxor.u32 2147483648, %v136_v9 }
   0x5   :  { %129 = vst [vmem:[%s265_s1 + $0x8] sm:$0x1] %v12_v4  ;;  %v140_v13 = vld [vmem:[%s264_s0 + $0xb] sm:$0x1]  ;;  %v52_v14 = vxor.u32 2147483648, %v138_v11 }
   0x6   :  { %131 = vst [vmem:[%s265_s1 + $0x1] sm:$0x1] %v20_v5  ;;  %v142_v15 = vld [vmem:[%s264_s0 + $0x4] sm:$0x1]  ;;  %v60_v16 = vxor.u32 2147483648, %v140_v13 }
   0x7   :  { %133 = vst [vmem:[%s265_s1 + $0x9] sm:$0x1] %v28_v7  ;;  %v144_v17 = vld [vmem:[%s264_s0 + $0xc] sm:$0x1]  ;;  %v68_v18 = vxor.u32 2147483648, %v142_v15 }
   0x8   :  { %135 = vst [vmem:[%s265_s1 + $0x2] sm:$0x1] %v36_v10  ;;  %v146_v19 = vld [vmem:[%s264_s0 + $0x5] sm:$0x1]  ;;  %v76_v20 = vxor.u32 2147483648, %v144_v17 }
   0x9   :  { %137 = vst [vmem:[%s265_s1 + $0xa] sm:$0x1] %v44_v12  ;;  %v148_v21 = vld [vmem:[%s264_s0 + $0xd] sm:$0x1]  ;;  %v84_v22 = vxor.u32 2147483648, %v146_v19 }
   0xa   :  { %139 = vst [vmem:[%s265_s1 + $0x3] sm:$0x1] %v52_v14  ;;  %v150_v23 = vld [vmem:[%s264_s0 + $0x6] sm:$0x1]  ;;  %v92_v24 = vxor.u32 2147483648, %v148_v21 }
   0xb   :  { %141 = vst [vmem:[%s265_s1 + $0xb] sm:$0x1] %v60_v16  ;;  %v152_v25 = vld [vmem:[%s264_s0 + $0xe] sm:$0x1]  ;;  %v100_v26 = vxor.u32 2147483648, %v150_v23 }
   0xc   :  { %143 = vst [vmem:[%s265_s1 + $0x4] sm:$0x1] %v68_v18  ;;  %v154_v27 = vld [vmem:[%s264_s0 + $0x7] sm:$0x1]  ;;  %v108_v28 = vxor.u32 2147483648, %v152_v25 }
   0xd   :  { %145 = vst [vmem:[%s265_s1 + $0xc] sm:$0x1] %v76_v20  ;;  %v156_v29 = vld [vmem:[%s264_s0 + $0xf] sm:$0x1]  ;;  %v116_v30 = vxor.u32 2147483648, %v154_v27 }
   0xe   :  { %147 = vst [vmem:[%s265_s1 + $0x5] sm:$0x1] %v84_v22  ;;  %v124_v31 = vxor.u32 2147483648, %v156_v29 }
   0xf   :  { %149 = vst [vmem:[%s265_s1 + $0xd] sm:$0x1] %v92_v24 }
  0x10   :  { %151 = vst [vmem:[%s265_s1 + $0x6] sm:$0x1] %v100_v26 }
  0x11   :  { %153 = vst [vmem:[%s265_s1 + $0xe] sm:$0x1] %v108_v28 }
  0x12   :  { %155 = vst [vmem:[%s265_s1 + $0x7] sm:$0x1] %v116_v30 }
  0x13   :  { %157 = vst [vmem:[%s265_s1 + $0xf] sm:$0x1] %v124_v31 }

// kernel: new_stereo_forward.5
= control target key start
LH: loop header
LB: loop body
LE: loop exit
PB: predicated region body
PF: predicated region fallthrough
CT: control target
= control target key end

     0   :  { %s677_s1 = inlined_call_operand.vmem [shape: bf16[128,256], index: 1, kind: input, shape index: {}]   ;;  %s678_s0 = inlined_call_operand.vmem [shape: bf16[128,128], index: 0, kind: input, shape index: {}]   ;;  %s679_s2 = inlined_call_operand.vmem [shape: f32[1,256], index: 2, kind: input, shape index: {}]   ;;  %s680_s3 = inlined_call_operand.vmem [shape: bf16[128,256], index: 3, kind: output, shape index: {}]  }
   0x1   :  { %v404_v0 = vld [vmem:[%s677_s1 + $0x70] sm:$0xf]  ;;  %v433_v1 = vld [vmem:[%s677_s1 + $0x74] sm:$0xf0]  ;;  %v432_v2 = vld [vmem:[%s677_s1 + $0x74] sm:$0xf] }
   0x2   :  { %v405_v3 = vor.u32 %v433_v1, %v404_v0  ;;  %v406_v4 = vld [vmem:[%s677_s1 + $0x78] sm:$0xf0]  ;;  %v396_v5 = vld [vmem:[%s677_s1 + $0x60] sm:$0xf]  ;;  %v431_v6 = vld [vmem:[%s677_s1 + $0x64] sm:$0xf0] }
   0x3   :  { %v409_v7 = vor.u32 %v432_v2, %v406_v4  ;;  %v430_v8 = vld [vmem:[%s677_s1 + $0x64] sm:$0xf]  ;;  %v398_v9 = vld [vmem:[%s677_s1 + $0x68] sm:$0xf0]  ;;  %v397_v10 = vor.u32 %v431_v6, %v396_v5  ;;  %v388_v12 = vld [vmem:[%s677_s1 + $0x50] sm:$0xf] }
   0x4   :  { %180 = vmatpush.bf16.msra.mxu0 %v405_v3  ;;  %434 = vmatpush.bf16.msra.mxu2 %v405_v3  ;;  %v401_v11 = vor.u32 %v430_v8, %v398_v9  ;;  %v429_v13 = vld [vmem:[%s677_s1 + $0x54] sm:$0xf0]  ;;  %v428_v14 = vld [vmem:[%s677_s1 + $0x54] sm:$0xf]  ;;  %v390_v15 = vld [vmem:[%s677_s1 + $0x58] sm:$0xf0] }
   0x5   :  { %229 = vmatpush.bf16.msra.mxu1 %v409_v7  ;;  %442 = vmatpush.bf16.msra.mxu3 %v409_v7  ;;  %v389_v16 = vor.u32 %v429_v13, %v388_v12  ;;  %v393_v17 = vor.u32 %v428_v14, %v390_v15  ;;  %v380_v18 = vld [vmem:[%s677_s1 + $0x40] sm:$0xf]  ;;  %v427_v19 = vld [vmem:[%s677_s1 + $0x44] sm:$0xf0]  ;;  %v426_v20 = vld [vmem:[%s677_s1 + $0x44] sm:$0xf] }
   0x6   :  { %v382_v21 = vld [vmem:[%s677_s1 + $0x48] sm:$0xf0]  ;;  %v381_v22 = vor.u32 %v427_v19, %v380_v18  ;;  %v372_v24 = vld [vmem:[%s677_s1 + $0x30] sm:$0xf]  ;;  %v425_v25 = vld [vmem:[%s677_s1 + $0x34] sm:$0xf0] }
   0x7   :  { %v385_v23 = vor.u32 %v426_v20, %v382_v21  ;;  %v424_v26 = vld [vmem:[%s677_s1 + $0x34] sm:$0xf]  ;;  %v374_v27 = vld [vmem:[%s677_s1 + $0x38] sm:$0xf0]  ;;  %v373_v28 = vor.u32 %v425_v25, %v372_v24  ;;  %v364_v30 = vld [vmem:[%s677_s1 + $0x20] sm:$0xf] }
   0x8   :  { %181 = vmatpush.bf16.msra.mxu0 %v397_v10  ;;  %435 = vmatpush.bf16.msra.mxu2 %v397_v10  ;;  %v377_v29 = vor.u32 %v424_v26, %v374_v27  ;;  %v423_v31 = vld [vmem:[%s677_s1 + $0x24] sm:$0xf0]  ;;  %v422_v32 = vld [vmem:[%s677_s1 + $0x24] sm:$0xf]  ;;  %v366_v33 = vld [vmem:[%s677_s1 + $0x28] sm:$0xf0] }
   0x9   :  { %230 = vmatpush.bf16.msra.mxu1 %v401_v11  ;;  %443 = vmatpush.bf16.msra.mxu3 %v401_v11  ;;  %v365_v34 = vor.u32 %v423_v31, %v364_v30  ;;  %v369_v35 = vor.u32 %v422_v32, %v366_v33  ;;  %v356_v36 = vld [vmem:[%s677_s1 + $0x10] sm:$0xf]  ;;  %v421_v37 = vld [vmem:[%s677_s1 + $0x14] sm:$0xf0]  ;;  %v420_v38 = vld [vmem:[%s677_s1 + $0x14] sm:$0xf] }
   0xa   :  { %v358_v39 = vld [vmem:[%s677_s1 + $0x18] sm:$0xf0]  ;;  %v357_v40 = vor.u32 %v421_v37, %v356_v36  ;;  %v348_v42 = vld [vmem:[%s677_s1] sm:$0xf]  ;;  %v419_v43 = vld [vmem:[%s677_s1 + $0x4] sm:$0xf0] }
   0xb   :  { %v361_v41 = vor.u32 %v420_v38, %v358_v39  ;;  %v418_v44 = vld [vmem:[%s677_s1 + $0x4] sm:$0xf]  ;;  %v350_v45 = vld [vmem:[%s677_s1 + $0x8] sm:$0xf0]  ;;  %v349_v46 = vor.u32 %v419_v43, %v348_v42  ;;  %v412_v52 = vld [vmem:[%s678_s0 + $0x10] sm:$0xff] }
   0xc   :  { %182 = vmatpush.bf16.msra.mxu0 %v389_v16  ;;  %436 = vmatpush.bf16.msra.mxu2 %v389_v16  ;;  %v353_v47 = vor.u32 %v418_v44, %v350_v45  ;;  %v410_v48 = vld [vmem:[%s678_s0] sm:$0xff]  ;;  %v411_v50 = vld [vmem:[%s678_s0 + $0x8] sm:$0xff]  ;;  %v416_v53 = vld [vmem:[%s678_s0 + $0x30] sm:$0xff] }
   0xd   :  { %231 = vmatpush.bf16.msra.mxu1 %v393_v17  ;;  %444 = vmatpush.bf16.msra.mxu3 %v393_v17  ;;  %v414_v49 = vld [vmem:[%s678_s0 + $0x20] sm:$0xff]  ;;  %v415_v51 = vld [vmem:[%s678_s0 + $0x28] sm:$0xff]  ;;  %v413_v54 = vld [vmem:[%s678_s0 + $0x18] sm:$0xff] }
   0xe   :  { %v417_v55 = vld [vmem:[%s678_s0 + $0x38] sm:$0xff]  ;;  %v46_v56 = vld [vmem:[%s679_s2] sm:$0x3] }
   0xf   :  { %v593_v57 = vperm.slane %v46_v56, 0  ;;  %v595_v58 = vperm.slane %v46_v56, 1 }
  0x10   :  { %183 = vmatpush.bf16.msra.mxu0 %v381_v22  ;;  %437 = vmatpush.bf16.msra.mxu2 %v381_v22 }
  0x11   :  { %232 = vmatpush.bf16.msra.mxu1 %v385_v23  ;;  %445 = vmatpush.bf16.msra.mxu3 %v385_v23 }
  0x14   :  { %184 = vmatpush.bf16.msra.mxu0 %v373_v28  ;;  %438 = vmatpush.bf16.msra.mxu2 %v373_v28 }
  0x15   :  { %233 = vmatpush.bf16.msra.mxu1 %v377_v29  ;;  %446 = vmatpush.bf16.msra.mxu3 %v377_v29 }
  0x18   :  { %185 = vmatpush.bf16.msra.mxu0 %v365_v34  ;;  %439 = vmatpush.bf16.msra.mxu2 %v365_v34 }
  0x19   :  { %234 = vmatpush.bf16.msra.mxu1 %v369_v35  ;;  %447 = vmatpush.bf16.msra.mxu3 %v369_v35 }
  0x1c   :  { %186 = vmatpush.bf16.msra.mxu0 %v357_v40  ;;  %440 = vmatpush.bf16.msra.mxu2 %v357_v40 }
  0x1d   :  { %235 = vmatpush.bf16.msra.mxu1 %v361_v41  ;;  %448 = vmatpush.bf16.msra.mxu3 %v361_v41 }
  0x20   :  { %187 = vmatpush.bf16.msra.mxu0 %v349_v46  ;;  %441 = vmatpush.bf16.msra.mxu2 %v349_v46 }
  0x21   :  { %236 = vmatpush.bf16.msra.mxu1 %v353_v47  ;;  %449 = vmatpush.bf16.msra.mxu3 %v353_v47 }
  0x23   :  { %188 = vmatmul.bf16.vlgmr.msra.gmra.mxu0 %v410_v48  ;;  %208 = vmatmul.bf16.vlgmr.msra.gmra.mxu2 %v414_v49 }
  0x24   :  { %237 = vmatmul.bf16.vlgmr.msra.gmra.mxu1 %v410_v48  ;;  %257 = vmatmul.bf16.vlgmr.msra.gmra.mxu3 %v414_v49 }
  0x33   :  { %193 = vmatmul.bf16.gmra.mxu0 %v411_v50  ;;  %213 = vmatmul.bf16.gmra.mxu2 %v415_v51 }
  0x34   :  { %242 = vmatmul.bf16.gmra.mxu1 %v411_v50  ;;  %262 = vmatmul.bf16.gmra.mxu3 %v415_v51 }
  0x43   :  { %198 = vmatmul.bf16.gmra.mxu0 %v412_v52  ;;  %218 = vmatmul.bf16.gmra.mxu2 %v416_v53 }
  0x44   :  { %247 = vmatmul.bf16.gmra.mxu1 %v412_v52  ;;  %267 = vmatmul.bf16.gmra.mxu3 %v416_v53 }
  0x53   :  { %203 = vmatmul.bf16.gmra.mxu0 %v413_v54  ;;  %223 = vmatmul.bf16.gmra.mxu2 %v417_v55 }
  0x54   :  { %252 = vmatmul.bf16.gmra.mxu1 %v413_v54  ;;  %272 = vmatmul.bf16.gmra.mxu3 %v417_v55 }
  0xa0   :  { %v189_v59 = vpop.f32.mrf.mxu0 }
  0xa1   :  { %v190_v60 = vadd.f32 %v189_v59, %v593_v57  ;;  %v238_v61 = vpop.f32.mrf.mxu1 }
  0xa2   :  { %v239_v62 = vadd.f32 %v238_v61, %v595_v58 }
  0xa4   :  { %v278_v63 = vpack.c.bf16 %v239_v62, %v190_v60 }
  0xa6   :  { %294 = vst [vmem:[%s680_s3] sm:$0xff] %v278_v63  ;;  %v209_v0 = vpop.f32.mrf.mxu2 }
  0xa7   :  { %v210_v1 = vadd.f32 %v209_v0, %v593_v57  ;;  %v258_v2 = vpop.f32.mrf.mxu3 }
  0xa8   :  { %v259_v3 = vadd.f32 %v258_v2, %v595_v58  ;;  %v191_v4 = vpop.f32.mrf.mxu0 }
  0xa9   :  { %v192_v5 = vadd.f32 %v191_v4, %v593_v57  ;;  %v240_v6 = vpop.f32.mrf.mxu1 }
  0xaa   :  { %v286_v7 = vpack.c.bf16 %v259_v3, %v210_v1  ;;  %v241_v8 = vadd.f32 %v240_v6, %v595_v58 }
  0xac   :  { %302 = vst [vmem:[%s680_s3 + $0x40] sm:$0xff] %v286_v7  ;;  %v279_v9 = vpack.c.bf16 %v241_v8, %v192_v5 }
  0xae   :  { %295 = vst [vmem:[%s680_s3 + $0x8] sm:$0xff] %v279_v9  ;;  %v211_v10 = vpop.f32.mrf.mxu2 }
  0xaf   :  { %v212_v11 = vadd.f32 %v211_v10, %v593_v57  ;;  %v260_v12 = vpop.f32.mrf.mxu3 }
  0xb0   :  { %v261_v13 = vadd.f32 %v260_v12, %v595_v58  ;;  %v194_v14 = vpop.f32.mrf.mxu0 }
  0xb1   :  { %v195_v15 = vadd.f32 %v194_v14, %v593_v57  ;;  %v243_v16 = vpop.f32.mrf.mxu1 }
  0xb2   :  { %v287_v17 = vpack.c.bf16 %v261_v13, %v212_v11  ;;  %v244_v18 = vadd.f32 %v243_v16, %v595_v58 }
  0xb4   :  { %303 = vst [vmem:[%s680_s3 + $0x48] sm:$0xff] %v287_v17  ;;  %v280_v19 = vpack.c.bf16 %v244_v18, %v195_v15 }
  0xb6   :  { %296 = vst [vmem:[%s680_s3 + $0x10] sm:$0xff] %v280_v19  ;;  %v214_v20 = vpop.f32.mrf.mxu2 }
  0xb7   :  { %v215_v21 = vadd.f32 %v214_v20, %v593_v57  ;;  %v263_v22 = vpop.f32.mrf.mxu3 }
  0xb8   :  { %v264_v23 = vadd.f32 %v263_v22, %v595_v58  ;;  %v196_v24 = vpop.f32.mrf.mxu0 }
  0xb9   :  { %v197_v25 = vadd.f32 %v196_v24, %v593_v57  ;;  %v245_v26 = vpop.f32.mrf.mxu1 }
  0xba   :  { %v288_v27 = vpack.c.bf16 %v264_v23, %v215_v21  ;;  %v246_v28 = vadd.f32 %v245_v26, %v595_v58 }
  0xbc   :  { %304 = vst [vmem:[%s680_s3 + $0x50] sm:$0xff] %v288_v27  ;;  %v281_v29 = vpack.c.bf16 %v246_v28, %v197_v25 }
  0xbe   :  { %297 = vst [vmem:[%s680_s3 + $0x18] sm:$0xff] %v281_v29  ;;  %v216_v30 = vpop.f32.mrf.mxu2 }
  0xbf   :  { %v217_v31 = vadd.f32 %v216_v30, %v593_v57  ;;  %v265_v32 = vpop.f32.mrf.mxu3 }
  0xc0   :  { %v266_v33 = vadd.f32 %v265_v32, %v595_v58  ;;  %v199_v34 = vpop.f32.mrf.mxu0 }
  0xc1   :  { %v200_v35 = vadd.f32 %v199_v34, %v593_v57  ;;  %v248_v36 = vpop.f32.mrf.mxu1 }
  0xc2   :  { %v289_v37 = vpack.c.bf16 %v266_v33, %v217_v31  ;;  %v249_v38 = vadd.f32 %v248_v36, %v595_v58 }
  0xc4   :  { %305 = vst [vmem:[%s680_s3 + $0x58] sm:$0xff] %v289_v37  ;;  %v282_v39 = vpack.c.bf16 %v249_v38, %v200_v35 }
  0xc6   :  { %298 = vst [vmem:[%s680_s3 + $0x20] sm:$0xff] %v282_v39  ;;  %v219_v40 = vpop.f32.mrf.mxu2 }
  0xc7   :  { %v220_v41 = vadd.f32 %v219_v40, %v593_v57  ;;  %v268_v42 = vpop.f32.mrf.mxu3 }
  0xc8   :  { %v269_v43 = vadd.f32 %v268_v42, %v595_v58  ;;  %v201_v44 = vpop.f32.mrf.mxu0 }
  0xc9   :  { %v202_v45 = vadd.f32 %v201_v44, %v593_v57  ;;  %v250_v46 = vpop.f32.mrf.mxu1 }
  0xca   :  { %v290_v47 = vpack.c.bf16 %v269_v43, %v220_v41  ;;  %v251_v48 = vadd.f32 %v250_v46, %v595_v58 }
  0xcc   :  { %306 = vst [vmem:[%s680_s3 + $0x60] sm:$0xff] %v290_v47  ;;  %v283_v49 = vpack.c.bf16 %v251_v48, %v202_v45 }
  0xce   :  { %299 = vst [vmem:[%s680_s3 + $0x28] sm:$0xff] %v283_v49  ;;  %v221_v50 = vpop.f32.mrf.mxu2 }
  0xcf   :  { %v222_v51 = vadd.f32 %v221_v50, %v593_v57  ;;  %v270_v52 = vpop.f32.mrf.mxu3 }
  0xd0   :  { %v271_v53 = vadd.f32 %v270_v52, %v595_v58  ;;  %v204_v54 = vpop.f32.mrf.mxu0 }
  0xd1   :  { %v205_v55 = vadd.f32 %v204_v54, %v593_v57  ;;  %v253_v56 = vpop.f32.mrf.mxu1 }
  0xd2   :  { %v291_v59 = vpack.c.bf16 %v271_v53, %v222_v51  ;;  %v254_v60 = vadd.f32 %v253_v56, %v595_v58 }
  0xd4   :  { %307 = vst [vmem:[%s680_s3 + $0x68] sm:$0xff] %v291_v59  ;;  %v284_v61 = vpack.c.bf16 %v254_v60, %v205_v55 }
  0xd6   :  { %300 = vst [vmem:[%s680_s3 + $0x30] sm:$0xff] %v284_v61  ;;  %v224_v62 = vpop.f32.mrf.mxu2 }
  0xd7   :  { %v225_v63 = vadd.f32 %v224_v62, %v593_v57  ;;  %v273_v0 = vpop.f32.mrf.mxu3 }
  0xd8   :  { %v274_v1 = vadd.f32 %v273_v0, %v595_v58  ;;  %v206_v2 = vpop.f32.mrf.mxu0 }
  0xd9   :  { %v207_v3 = vadd.f32 %v206_v2, %v593_v57  ;;  %v255_v4 = vpop.f32.mrf.mxu1 }
  0xda   :  { %v292_v5 = vpack.c.bf16 %v274_v1, %v225_v63  ;;  %v256_v6 = vadd.f32 %v255_v4, %v595_v58 }
  0xdc   :  { %308 = vst [vmem:[%s680_s3 + $0x70] sm:$0xff] %v292_v5  ;;  %v285_v7 = vpack.c.bf16 %v256_v6, %v207_v3 }
  0xde   :  { %301 = vst [vmem:[%s680_s3 + $0x38] sm:$0xff] %v285_v7  ;;  %v226_v8 = vpop.f32.mrf.mxu2 }
  0xdf   :  { %v227_v9 = vadd.f32 %v226_v8, %v593_v57  ;;  %v275_v10 = vpop.f32.mrf.mxu3 }
  0xe0   :  { %v276_v11 = vadd.f32 %v275_v10, %v595_v58 }
  0xe2   :  { %v293_v12 = vpack.c.bf16 %v276_v11, %v227_v9 }
  0xe4   :  { %309 = vst [vmem:[%s680_s3 + $0x78] sm:$0xff] %v293_v12 }

// kernel: new_stereo_forward.4
= control target key start
LH: loop header
LB: loop body
LE: loop exit
PB: predicated region body
PF: predicated region fallthrough
CT: control target
= control target key end

     0   :  { %s1162_s1 = inlined_call_operand.vmem [shape: bf16[128,512], index: 1, kind: input, shape index: {}]   ;;  %s1163_s0 = inlined_call_operand.vmem [shape: bf16[128,128], index: 0, kind: input, shape index: {}]   ;;  %s1164_s2 = inlined_call_operand.vmem [shape: f32[1,512], index: 2, kind: input, shape index: {}]   ;;  %s1165_s3 = inlined_call_operand.vmem [shape: bf16[128,256], index: 3, kind: output, shape index: {0}]   ;;  %s1166_s4 = inlined_call_operand.vmem [shape: bf16[128,256], index: 4, kind: output, shape index: {1}]  }
   0x1   :  { %v696_v0 = vld [vmem:[%s1162_s1 + $0xe0] sm:$0xf]  ;;  %v748_v1 = vld [vmem:[%s1162_s1 + $0xec] sm:$0xf0]  ;;  %v746_v2 = vld [vmem:[%s1162_s1 + $0xe4] sm:$0xf] }
   0x2   :  { %v697_v3 = vor.u32 %v748_v1, %v696_v0  ;;  %v698_v4 = vld [vmem:[%s1162_s1 + $0xf0] sm:$0xf0]  ;;  %v704_v5 = vld [vmem:[%s1162_s1 + $0xe8] sm:$0xf]  ;;  %v749_v6 = vld [vmem:[%s1162_s1 + $0xf4] sm:$0xf0] }
   0x3   :  { %v701_v7 = vor.u32 %v746_v2, %v698_v4  ;;  %v705_v8 = vor.u32 %v749_v6, %v704_v5  ;;  %v747_v9 = vld [vmem:[%s1162_s1 + $0xec] sm:$0xf]  ;;  %v706_v10 = vld [vmem:[%s1162_s1 + $0xf8] sm:$0xf0]  ;;  %v680_v11 = vld [vmem:[%s1162_s1 + $0xc0] sm:$0xf] }
   0x4   :  { %282 = vmatpush.bf16.msra.mxu0 %v697_v3  ;;  %v709_v12 = vor.u32 %v747_v9, %v706_v10  ;;  %v744_v13 = vld [vmem:[%s1162_s1 + $0xcc] sm:$0xf0]  ;;  %v742_v14 = vld [vmem:[%s1162_s1 + $0xc4] sm:$0xf]  ;;  %v682_v15 = vld [vmem:[%s1162_s1 + $0xd0] sm:$0xf0] }
   0x5   :  { %331 = vmatpush.bf16.msra.mxu1 %v701_v7  ;;  %380 = vmatpush.bf16.msra.mxu2 %v705_v8  ;;  %v681_v16 = vor.u32 %v744_v13, %v680_v11  ;;  %v685_v17 = vor.u32 %v742_v14, %v682_v15  ;;  %v688_v18 = vld [vmem:[%s1162_s1 + $0xc8] sm:$0xf]  ;;  %v745_v19 = vld [vmem:[%s1162_s1 + $0xd4] sm:$0xf0]  ;;  %v743_v20 = vld [vmem:[%s1162_s1 + $0xcc] sm:$0xf] }
   0x6   :  { %429 = vmatpush.bf16.msra.mxu3 %v709_v12  ;;  %v689_v21 = vor.u32 %v745_v19, %v688_v18  ;;  %v690_v22 = vld [vmem:[%s1162_s1 + $0xd8] sm:$0xf0]  ;;  %v664_v23 = vld [vmem:[%s1162_s1 + $0xa0] sm:$0xf]  ;;  %v740_v24 = vld [vmem:[%s1162_s1 + $0xac] sm:$0xf0] }
   0x7   :  { %v693_v25 = vor.u32 %v743_v20, %v690_v22  ;;  %v738_v26 = vld [vmem:[%s1162_s1 + $0xa4] sm:$0xf]  ;;  %v666_v27 = vld [vmem:[%s1162_s1 + $0xb0] sm:$0xf0]  ;;  %v672_v28 = vld [vmem:[%s1162_s1 + $0xa8] sm:$0xf]  ;;  %v665_v29 = vor.u32 %v740_v24, %v664_v23 }
   0x8   :  { %283 = vmatpush.bf16.msra.mxu0 %v681_v16  ;;  %v741_v30 = vld [vmem:[%s1162_s1 + $0xb4] sm:$0xf0]  ;;  %v739_v31 = vld [vmem:[%s1162_s1 + $0xac] sm:$0xf]  ;;  %v674_v32 = vld [vmem:[%s1162_s1 + $0xb8] sm:$0xf0]  ;;  %v669_v33 = vor.u32 %v738_v26, %v666_v27 }
   0x9   :  { %332 = vmatpush.bf16.msra.mxu1 %v685_v17  ;;  %381 = vmatpush.bf16.msra.mxu2 %v689_v21  ;;  %v673_v34 = vor.u32 %v741_v30, %v672_v28  ;;  %v648_v35 = vld [vmem:[%s1162_s1 + $0x80] sm:$0xf]  ;;  %v736_v36 = vld [vmem:[%s1162_s1 + $0x8c] sm:$0xf0]  ;;  %v734_v37 = vld [vmem:[%s1162_s1 + $0x84] sm:$0xf]  ;;  %v677_v38 = vor.u32 %v739_v31, %v674_v32 }
   0xa   :  { %430 = vmatpush.bf16.msra.mxu3 %v693_v25  ;;  %v650_v39 = vld [vmem:[%s1162_s1 + $0x90] sm:$0xf0]  ;;  %v656_v40 = vld [vmem:[%s1162_s1 + $0x88] sm:$0xf]  ;;  %v737_v41 = vld [vmem:[%s1162_s1 + $0x94] sm:$0xf0]  ;;  %v649_v44 = vor.u32 %v736_v36, %v648_v35 }
   0xb   :  { %v735_v42 = vld [vmem:[%s1162_s1 + $0x8c] sm:$0xf]  ;;  %v658_v43 = vld [vmem:[%s1162_s1 + $0x98] sm:$0xf0]  ;;  %v653_v45 = vor.u32 %v734_v37, %v650_v39  ;;  %v657_v46 = vor.u32 %v737_v41, %v656_v40  ;;  %v632_v47 = vld [vmem:[%s1162_s1 + $0x60] sm:$0xf] }
   0xc   :  { %284 = vmatpush.bf16.msra.mxu0 %v665_v29  ;;  %v732_v48 = vld [vmem:[%s1162_s1 + $0x6c] sm:$0xf0]  ;;  %v730_v49 = vld [vmem:[%s1162_s1 + $0x64] sm:$0xf]  ;;  %v661_v50 = vor.u32 %v735_v42, %v658_v43  ;;  %v634_v51 = vld [vmem:[%s1162_s1 + $0x70] sm:$0xf0] }
   0xd   :  { %333 = vmatpush.bf16.msra.mxu1 %v669_v33  ;;  %382 = vmatpush.bf16.msra.mxu2 %v673_v34  ;;  %v640_v52 = vld [vmem:[%s1162_s1 + $0x68] sm:$0xf]  ;;  %v733_v53 = vld [vmem:[%s1162_s1 + $0x74] sm:$0xf0]  ;;  %v731_v54 = vld [vmem:[%s1162_s1 + $0x6c] sm:$0xf]  ;;  %v633_v56 = vor.u32 %v732_v48, %v632_v47  ;;  %v637_v57 = vor.u32 %v730_v49, %v634_v51 }
   0xe   :  { %431 = vmatpush.bf16.msra.mxu3 %v677_v38  ;;  %v642_v55 = vld [vmem:[%s1162_s1 + $0x78] sm:$0xf0]  ;;  %v641_v58 = vor.u32 %v733_v53, %v640_v52  ;;  %v616_v59 = vld [vmem:[%s1162_s1 + $0x40] sm:$0xf]  ;;  %v728_v60 = vld [vmem:[%s1162_s1 + $0x4c] sm:$0xf0] }
   0xf   :  { %v726_v61 = vld [vmem:[%s1162_s1 + $0x44] sm:$0xf]  ;;  %v645_v62 = vor.u32 %v731_v54, %v642_v55  ;;  %v618_v63 = vld [vmem:[%s1162_s1 + $0x50] sm:$0xf0]  ;;  %v624_v0 = vld [vmem:[%s1162_s1 + $0x48] sm:$0xf]  ;;  %v617_v4 = vor.u32 %v728_v60, %v616_v59 }
  0x10   :  { %285 = vmatpush.bf16.msra.mxu0 %v649_v44  ;;  %v729_v1 = vld [vmem:[%s1162_s1 + $0x54] sm:$0xf0]  ;;  %v727_v2 = vld [vmem:[%s1162_s1 + $0x4c] sm:$0xf]  ;;  %v626_v3 = vld [vmem:[%s1162_s1 + $0x58] sm:$0xf0]  ;;  %v621_v5 = vor.u32 %v726_v61, %v618_v63 }
  0x11   :  { %334 = vmatpush.bf16.msra.mxu1 %v653_v45  ;;  %383 = vmatpush.bf16.msra.mxu2 %v657_v46  ;;  %v625_v6 = vor.u32 %v729_v1, %v624_v0  ;;  %v600_v7 = vld [vmem:[%s1162_s1 + $0x20] sm:$0xf]  ;;  %v724_v8 = vld [vmem:[%s1162_s1 + $0x2c] sm:$0xf0]  ;;  %v722_v9 = vld [vmem:[%s1162_s1 + $0x24] sm:$0xf]  ;;  %v629_v10 = vor.u32 %v727_v2, %v626_v3 }
  0x12   :  { %432 = vmatpush.bf16.msra.mxu3 %v661_v50  ;;  %v602_v11 = vld [vmem:[%s1162_s1 + $0x30] sm:$0xf0]  ;;  %v608_v12 = vld [vmem:[%s1162_s1 + $0x28] sm:$0xf]  ;;  %v725_v13 = vld [vmem:[%s1162_s1 + $0x34] sm:$0xf0]  ;;  %v601_v16 = vor.u32 %v724_v8, %v600_v7 }
  0x13   :  { %v723_v14 = vld [vmem:[%s1162_s1 + $0x2c] sm:$0xf]  ;;  %v610_v15 = vld [vmem:[%s1162_s1 + $0x38] sm:$0xf0]  ;;  %v605_v17 = vor.u32 %v722_v9, %v602_v11  ;;  %v609_v18 = vor.u32 %v725_v13, %v608_v12  ;;  %v584_v19 = vld [vmem:[%s1162_s1] sm:$0xf] }
  0x14   :  { %286 = vmatpush.bf16.msra.mxu0 %v633_v56  ;;  %v720_v20 = vld [vmem:[%s1162_s1 + $0xc] sm:$0xf0]  ;;  %v718_v21 = vld [vmem:[%s1162_s1 + $0x4] sm:$0xf]  ;;  %v613_v22 = vor.u32 %v723_v14, %v610_v15  ;;  %v586_v23 = vld [vmem:[%s1162_s1 + $0x10] sm:$0xf0] }
  0x15   :  { %335 = vmatpush.bf16.msra.mxu1 %v637_v57  ;;  %384 = vmatpush.bf16.msra.mxu2 %v641_v58  ;;  %v592_v24 = vld [vmem:[%s1162_s1 + $0x8] sm:$0xf]  ;;  %v721_v25 = vld [vmem:[%s1162_s1 + $0x14] sm:$0xf0]  ;;  %v719_v26 = vld [vmem:[%s1162_s1 + $0xc] sm:$0xf]  ;;  %v585_v28 = vor.u32 %v720_v20, %v584_v19  ;;  %v589_v29 = vor.u32 %v718_v21, %v586_v23 }
  0x16   :  { %433 = vmatpush.bf16.msra.mxu3 %v645_v62  ;;  %v594_v27 = vld [vmem:[%s1162_s1 + $0x18] sm:$0xf0]  ;;  %v593_v30 = vor.u32 %v721_v25, %v592_v24  ;;  %v710_v32 = vld [vmem:[%s1163_s0] sm:$0xff]  ;;  %v711_v33 = vld [vmem:[%s1163_s0 + $0x8] sm:$0xff] }
  0x17   :  { %v597_v31 = vor.u32 %v719_v26, %v594_v27  ;;  %v712_v34 = vld [vmem:[%s1163_s0 + $0x10] sm:$0xff]  ;;  %v713_v35 = vld [vmem:[%s1163_s0 + $0x18] sm:$0xff]  ;;  %v714_v36 = vld [vmem:[%s1163_s0 + $0x20] sm:$0xff] }
  0x18   :  { %287 = vmatpush.bf16.msra.mxu0 %v617_v4  ;;  %v715_v37 = vld [vmem:[%s1163_s0 + $0x28] sm:$0xff]  ;;  %v716_v38 = vld [vmem:[%s1163_s0 + $0x30] sm:$0xff]  ;;  %v717_v39 = vld [vmem:[%s1163_s0 + $0x38] sm:$0xff] }
  0x19   :  { %336 = vmatpush.bf16.msra.mxu1 %v621_v5  ;;  %385 = vmatpush.bf16.msra.mxu2 %v625_v6  ;;  %v64_v40 = vld [vmem:[%s1164_s2] sm:$0xf] }
  0x1a   :  { %434 = vmatpush.bf16.msra.mxu3 %v629_v10  ;;  %v994_v41 = vperm.slane %v64_v40, 0  ;;  %v996_v42 = vperm.slane %v64_v40, 1  ;;  %v1000_v48 = vperm.slane %v64_v40, 2  ;;  %v1002_v49 = vperm.slane %v64_v40, 3 }
  0x1c   :  { %288 = vmatpush.bf16.msra.mxu0 %v601_v16 }
  0x1d   :  { %337 = vmatpush.bf16.msra.mxu1 %v605_v17  ;;  %386 = vmatpush.bf16.msra.mxu2 %v609_v18 }
  0x1e   :  { %435 = vmatpush.bf16.msra.mxu3 %v613_v22 }
  0x20   :  { %289 = vmatpush.bf16.msra.mxu0 %v585_v28 }
  0x21   :  { %338 = vmatpush.bf16.msra.mxu1 %v589_v29  ;;  %387 = vmatpush.bf16.msra.mxu2 %v593_v30 }
  0x22   :  { %436 = vmatpush.bf16.msra.mxu3 %v597_v31 }
  0x23   :  { %290 = vmatmul.bf16.vlgmr.msra.gmra.mxu0 %v710_v32 }
  0x24   :  { %339 = vmatmul.bf16.vlgmr.msra.gmra.mxu1 %v710_v32  ;;  %388 = vmatmul.bf16.vlgmr.msra.gmra.mxu2 %v710_v32 }
  0x25   :  { %437 = vmatmul.bf16.vlgmr.msra.gmra.mxu3 %v710_v32 }
  0x33   :  { %295 = vmatmul.bf16.gmra.mxu0 %v711_v33 }
  0x34   :  { %344 = vmatmul.bf16.gmra.mxu1 %v711_v33  ;;  %393 = vmatmul.bf16.gmra.mxu2 %v711_v33 }
  0x35   :  { %442 = vmatmul.bf16.gmra.mxu3 %v711_v33 }
  0x43   :  { %300 = vmatmul.bf16.gmra.mxu0 %v712_v34 }
  0x44   :  { %349 = vmatmul.bf16.gmra.mxu1 %v712_v34  ;;  %398 = vmatmul.bf16.gmra.mxu2 %v712_v34 }
  0x45   :  { %447 = vmatmul.bf16.gmra.mxu3 %v712_v34 }
  0x53   :  { %305 = vmatmul.bf16.gmra.mxu0 %v713_v35 }
  0x54   :  { %354 = vmatmul.bf16.gmra.mxu1 %v713_v35  ;;  %403 = vmatmul.bf16.gmra.mxu2 %v713_v35 }
  0x55   :  { %452 = vmatmul.bf16.gmra.mxu3 %v713_v35 }
  0x63   :  { %310 = vmatmul.bf16.gmra.mxu0 %v714_v36 }
  0x64   :  { %359 = vmatmul.bf16.gmra.mxu1 %v714_v36  ;;  %408 = vmatmul.bf16.gmra.mxu2 %v714_v36 }
  0x65   :  { %457 = vmatmul.bf16.gmra.mxu3 %v714_v36 }
  0x73   :  { %315 = vmatmul.bf16.gmra.mxu0 %v715_v37 }
  0x74   :  { %364 = vmatmul.bf16.gmra.mxu1 %v715_v37  ;;  %413 = vmatmul.bf16.gmra.mxu2 %v715_v37 }
  0x75   :  { %462 = vmatmul.bf16.gmra.mxu3 %v715_v37 }
  0x83   :  { %320 = vmatmul.bf16.gmra.mxu0 %v716_v38 }
  0x84   :  { %369 = vmatmul.bf16.gmra.mxu1 %v716_v38  ;;  %418 = vmatmul.bf16.gmra.mxu2 %v716_v38 }
  0x85   :  { %467 = vmatmul.bf16.gmra.mxu3 %v716_v38 }
  0x93   :  { %325 = vmatmul.bf16.gmra.mxu0 %v717_v39 }
  0x94   :  { %374 = vmatmul.bf16.gmra.mxu1 %v717_v39  ;;  %423 = vmatmul.bf16.gmra.mxu2 %v717_v39 }
  0x95   :  { %472 = vmatmul.bf16.gmra.mxu3 %v717_v39 }
  0xa0   :  { %v291_v43 = vpop.f32.mrf.mxu0 }
  0xa1   :  { %v292_v44 = vadd.f32 %v291_v43, %v994_v41  ;;  %v340_v45 = vpop.f32.mrf.mxu1 }
  0xa2   :  { %v341_v46 = vadd.f32 %v340_v45, %v996_v42 }
  0xa4   :  { %v478_v47 = vpack.c.bf16 %v341_v46, %v292_v44 }
  0xa6   :  { %494 = vst [vmem:[%s1165_s3] sm:$0xff] %v478_v47 }
  0xa7   :  { %v389_v50 = vpop.f32.mrf.mxu2 }
  0xa8   :  { %v390_v51 = vadd.f32 %v389_v50, %v1000_v48  ;;  %v438_v52 = vpop.f32.mrf.mxu3  ;;  %v293_v53 = vpop.f32.mrf.mxu0 }
  0xa9   :  { %v439_v54 = vadd.f32 %v438_v52, %v1002_v49  ;;  %v294_v55 = vadd.f32 %v293_v53, %v994_v41  ;;  %v342_v56 = vpop.f32.mrf.mxu1 }
  0xaa   :  { %v343_v57 = vadd.f32 %v342_v56, %v996_v42 }
  0xab   :  { %v510_v58 = vpack.c.bf16 %v439_v54, %v390_v51 }
  0xac   :  { %v479_v59 = vpack.c.bf16 %v343_v57, %v294_v55 }
  0xad   :  { %526 = vst [vmem:[%s1166_s4] sm:$0xff] %v510_v58 }
  0xae   :  { %495 = vst [vmem:[%s1165_s3 + $0x8] sm:$0xff] %v479_v59 }
  0xaf   :  { %v391_v60 = vpop.f32.mrf.mxu2 }
  0xb0   :  { %v392_v61 = vadd.f32 %v391_v60, %v1000_v48  ;;  %v440_v62 = vpop.f32.mrf.mxu3  ;;  %v296_v63 = vpop.f32.mrf.mxu0 }
  0xb1   :  { %v441_v0 = vadd.f32 %v440_v62, %v1002_v49  ;;  %v297_v1 = vadd.f32 %v296_v63, %v994_v41  ;;  %v345_v2 = vpop.f32.mrf.mxu1 }
  0xb2   :  { %v346_v3 = vadd.f32 %v345_v2, %v996_v42 }
  0xb3   :  { %v511_v4 = vpack.c.bf16 %v441_v0, %v392_v61 }
  0xb4   :  { %v480_v5 = vpack.c.bf16 %v346_v3, %v297_v1 }
  0xb5   :  { %527 = vst [vmem:[%s1166_s4 + $0x8] sm:$0xff] %v511_v4 }
  0xb6   :  { %496 = vst [vmem:[%s1165_s3 + $0x10] sm:$0xff] %v480_v5 }
  0xb7   :  { %v394_v6 = vpop.f32.mrf.mxu2 }
  0xb8   :  { %v395_v7 = vadd.f32 %v394_v6, %v1000_v48  ;;  %v443_v8 = vpop.f32.mrf.mxu3  ;;  %v298_v9 = vpop.f32.mrf.mxu0 }
  0xb9   :  { %v444_v10 = vadd.f32 %v443_v8, %v1002_v49  ;;  %v299_v11 = vadd.f32 %v298_v9, %v994_v41  ;;  %v347_v12 = vpop.f32.mrf.mxu1 }
  0xba   :  { %v348_v13 = vadd.f32 %v347_v12, %v996_v42 }
  0xbb   :  { %v512_v14 = vpack.c.bf16 %v444_v10, %v395_v7 }
  0xbc   :  { %v481_v15 = vpack.c.bf16 %v348_v13, %v299_v11 }
  0xbd   :  { %528 = vst [vmem:[%s1166_s4 + $0x10] sm:$0xff] %v512_v14 }
  0xbe   :  { %497 = vst [vmem:[%s1165_s3 + $0x18] sm:$0xff] %v481_v15 }
  0xbf   :  { %v396_v16 = vpop.f32.mrf.mxu2 }
  0xc0   :  { %v397_v17 = vadd.f32 %v396_v16, %v1000_v48  ;;  %v445_v18 = vpop.f32.mrf.mxu3  ;;  %v301_v19 = vpop.f32.mrf.mxu0 }
  0xc1   :  { %v446_v20 = vadd.f32 %v445_v18, %v1002_v49  ;;  %v302_v21 = vadd.f32 %v301_v19, %v994_v41  ;;  %v350_v22 = vpop.f32.mrf.mxu1 }
  0xc2   :  { %v351_v23 = vadd.f32 %v350_v22, %v996_v42 }
  0xc3   :  { %v513_v24 = vpack.c.bf16 %v446_v20, %v397_v17 }
  0xc4   :  { %v482_v25 = vpack.c.bf16 %v351_v23, %v302_v21 }
  0xc5   :  { %529 = vst [vmem:[%s1166_s4 + $0x18] sm:$0xff] %v513_v24 }
  0xc6   :  { %498 = vst [vmem:[%s1165_s3 + $0x20] sm:$0xff] %v482_v25 }
  0xc7   :  { %v399_v26 = vpop.f32.mrf.mxu2 }
  0xc8   :  { %v400_v27 = vadd.f32 %v399_v26, %v1000_v48  ;;  %v448_v28 = vpop.f32.mrf.mxu3  ;;  %v303_v29 = vpop.f32.mrf.mxu0 }
  0xc9   :  { %v449_v30 = vadd.f32 %v448_v28, %v1002_v49  ;;  %v304_v31 = vadd.f32 %v303_v29, %v994_v41  ;;  %v352_v32 = vpop.f32.mrf.mxu1 }
  0xca   :  { %v353_v33 = vadd.f32 %v352_v32, %v996_v42 }
  0xcb   :  { %v514_v34 = vpack.c.bf16 %v449_v30, %v400_v27 }
  0xcc   :  { %v483_v35 = vpack.c.bf16 %v353_v33, %v304_v31 }
  0xcd   :  { %530 = vst [vmem:[%s1166_s4 + $0x20] sm:$0xff] %v514_v34 }
  0xce   :  { %499 = vst [vmem:[%s1165_s3 + $0x28] sm:$0xff] %v483_v35 }
  0xcf   :  { %v401_v36 = vpop.f32.mrf.mxu2 }
  0xd0   :  { %v402_v37 = vadd.f32 %v401_v36, %v1000_v48  ;;  %v450_v38 = vpop.f32.mrf.mxu3  ;;  %v306_v39 = vpop.f32.mrf.mxu0 }
  0xd1   :  { %v451_v40 = vadd.f32 %v450_v38, %v1002_v49  ;;  %v307_v43 = vadd.f32 %v306_v39, %v994_v41  ;;  %v355_v44 = vpop.f32.mrf.mxu1 }
  0xd2   :  { %v356_v45 = vadd.f32 %v355_v44, %v996_v42 }
  0xd3   :  { %v515_v46 = vpack.c.bf16 %v451_v40, %v402_v37 }
  0xd4   :  { %v484_v47 = vpack.c.bf16 %v356_v45, %v307_v43 }
  0xd5   :  { %531 = vst [vmem:[%s1166_s4 + $0x28] sm:$0xff] %v515_v46 }
  0xd6   :  { %500 = vst [vmem:[%s1165_s3 + $0x30] sm:$0xff] %v484_v47 }
  0xd7   :  { %v404_v50 = vpop.f32.mrf.mxu2 }
  0xd8   :  { %v405_v51 = vadd.f32 %v404_v50, %v1000_v48  ;;  %v453_v52 = vpop.f32.mrf.mxu3  ;;  %v308_v53 = vpop.f32.mrf.mxu0 }
  0xd9   :  { %v454_v54 = vadd.f32 %v453_v52, %v1002_v49  ;;  %v309_v55 = vadd.f32 %v308_v53, %v994_v41  ;;  %v357_v56 = vpop.f32.mrf.mxu1 }
  0xda   :  { %v358_v57 = vadd.f32 %v357_v56, %v996_v42 }
  0xdb   :  { %v516_v58 = vpack.c.bf16 %v454_v54, %v405_v51 }
  0xdc   :  { %v485_v59 = vpack.c.bf16 %v358_v57, %v309_v55 }
  0xdd   :  { %532 = vst [vmem:[%s1166_s4 + $0x30] sm:$0xff] %v516_v58 }
  0xde   :  { %501 = vst [vmem:[%s1165_s3 + $0x38] sm:$0xff] %v485_v59 }
  0xdf   :  { %v406_v60 = vpop.f32.mrf.mxu2 }
  0xe0   :  { %v407_v61 = vadd.f32 %v406_v60, %v1000_v48  ;;  %v455_v62 = vpop.f32.mrf.mxu3  ;;  %v311_v63 = vpop.f32.mrf.mxu0 }
  0xe1   :  { %v456_v0 = vadd.f32 %v455_v62, %v1002_v49  ;;  %v312_v1 = vadd.f32 %v311_v63, %v994_v41  ;;  %v360_v2 = vpop.f32.mrf.mxu1 }
  0xe2   :  { %v361_v3 = vadd.f32 %v360_v2, %v996_v42 }
  0xe3   :  { %v517_v4 = vpack.c.bf16 %v456_v0, %v407_v61 }
  0xe4   :  { %v486_v5 = vpack.c.bf16 %v361_v3, %v312_v1 }
  0xe5   :  { %533 = vst [vmem:[%s1166_s4 + $0x38] sm:$0xff] %v517_v4 }
  0xe6   :  { %502 = vst [vmem:[%s1165_s3 + $0x40] sm:$0xff] %v486_v5 }
  0xe7   :  { %v409_v6 = vpop.f32.mrf.mxu2 }
  0xe8   :  { %v410_v7 = vadd.f32 %v409_v6, %v1000_v48  ;;  %v458_v8 = vpop.f32.mrf.mxu3  ;;  %v313_v9 = vpop.f32.mrf.mxu0 }
  0xe9   :  { %v459_v10 = vadd.f32 %v458_v8, %v1002_v49  ;;  %v314_v11 = vadd.f32 %v313_v9, %v994_v41  ;;  %v362_v12 = vpop.f32.mrf.mxu1 }
  0xea   :  { %v363_v13 = vadd.f32 %v362_v12, %v996_v42 }
  0xeb   :  { %v518_v14 = vpack.c.bf16 %v459_v10, %v410_v7 }
  0xec   :  { %v487_v15 = vpack.c.bf16 %v363_v13, %v314_v11 }
  0xed   :  { %534 = vst [vmem:[%s1166_s4 + $0x40] sm:$0xff] %v518_v14 }
  0xee   :  { %503 = vst [vmem:[%s1165_s3 + $0x48] sm:$0xff] %v487_v15 }
  0xef   :  { %v411_v16 = vpop.f32.mrf.mxu2 }
  0xf0   :  { %v412_v17 = vadd.f32 %v411_v16, %v1000_v48  ;;  %v460_v18 = vpop.f32.mrf.mxu3  ;;  %v316_v19 = vpop.f32.mrf.mxu0 }
  0xf1   :  { %v461_v20 = vadd.f32 %v460_v18, %v1002_v49  ;;  %v317_v21 = vadd.f32 %v316_v19, %v994_v41  ;;  %v365_v22 = vpop.f32.mrf.mxu1 }
  0xf2   :  { %v366_v23 = vadd.f32 %v365_v22, %v996_v42 }
  0xf3   :  { %v519_v24 = vpack.c.bf16 %v461_v20, %v412_v17 }
  0xf4   :  { %v488_v25 = vpack.c.bf16 %v366_v23, %v317_v21 }
  0xf5   :  { %535 = vst [vmem:[%s1166_s4 + $0x48] sm:$0xff] %v519_v24 }
  0xf6   :  { %504 = vst [vmem:[%s1165_s3 + $0x50] sm:$0xff] %v488_v25 }
  0xf7   :  { %v414_v26 = vpop.f32.mrf.mxu2 }
  0xf8   :  { %v415_v27 = vadd.f32 %v414_v26, %v1000_v48  ;;  %v463_v28 = vpop.f32.mrf.mxu3  ;;  %v318_v29 = vpop.f32.mrf.mxu0 }
  0xf9   :  { %v464_v30 = vadd.f32 %v463_v28, %v1002_v49  ;;  %v319_v31 = vadd.f32 %v318_v29, %v994_v41  ;;  %v367_v32 = vpop.f32.mrf.mxu1 }
  0xfa   :  { %v368_v33 = vadd.f32 %v367_v32, %v996_v42 }
  0xfb   :  { %v520_v34 = vpack.c.bf16 %v464_v30, %v415_v27 }
  0xfc   :  { %v489_v35 = vpack.c.bf16 %v368_v33, %v319_v31 }
  0xfd   :  { %536 = vst [vmem:[%s1166_s4 + $0x50] sm:$0xff] %v520_v34 }
  0xfe   :  { %505 = vst [vmem:[%s1165_s3 + $0x58] sm:$0xff] %v489_v35 }
  0xff   :  { %v416_v36 = vpop.f32.mrf.mxu2 }
 0x100   :  { %v417_v37 = vadd.f32 %v416_v36, %v1000_v48  ;;  %v465_v38 = vpop.f32.mrf.mxu3  ;;  %v321_v39 = vpop.f32.mrf.mxu0 }
 0x101   :  { %v466_v40 = vadd.f32 %v465_v38, %v1002_v49  ;;  %v322_v43 = vadd.f32 %v321_v39, %v994_v41  ;;  %v370_v44 = vpop.f32.mrf.mxu1 }
 0x102   :  { %v371_v45 = vadd.f32 %v370_v44, %v996_v42 }
 0x103   :  { %v521_v46 = vpack.c.bf16 %v466_v40, %v417_v37 }
 0x104   :  { %v490_v47 = vpack.c.bf16 %v371_v45, %v322_v43 }
 0x105   :  { %537 = vst [vmem:[%s1166_s4 + $0x58] sm:$0xff] %v521_v46 }
 0x106   :  { %506 = vst [vmem:[%s1165_s3 + $0x60] sm:$0xff] %v490_v47 }
 0x107   :  { %v419_v50 = vpop.f32.mrf.mxu2 }
 0x108   :  { %v420_v51 = vadd.f32 %v419_v50, %v1000_v48  ;;  %v468_v52 = vpop.f32.mrf.mxu3  ;;  %v323_v53 = vpop.f32.mrf.mxu0 }
 0x109   :  { %v469_v54 = vadd.f32 %v468_v52, %v1002_v49  ;;  %v324_v55 = vadd.f32 %v323_v53, %v994_v41  ;;  %v372_v56 = vpop.f32.mrf.mxu1 }
 0x10a   :  { %v373_v57 = vadd.f32 %v372_v56, %v996_v42 }
 0x10b   :  { %v522_v58 = vpack.c.bf16 %v469_v54, %v420_v51 }
 0x10c   :  { %v491_v59 = vpack.c.bf16 %v373_v57, %v324_v55 }
 0x10d   :  { %538 = vst [vmem:[%s1166_s4 + $0x60] sm:$0xff] %v522_v58 }
 0x10e   :  { %507 = vst [vmem:[%s1165_s3 + $0x68] sm:$0xff] %v491_v59 }
 0x10f   :  { %v421_v60 = vpop.f32.mrf.mxu2 }
 0x110   :  { %v422_v61 = vadd.f32 %v421_v60, %v1000_v48  ;;  %v470_v62 = vpop.f32.mrf.mxu3  ;;  %v326_v63 = vpop.f32.mrf.mxu0 }
 0x111   :  { %v471_v0 = vadd.f32 %v470_v62, %v1002_v49  ;;  %v327_v1 = vadd.f32 %v326_v63, %v994_v41  ;;  %v375_v2 = vpop.f32.mrf.mxu1 }
 0x112   :  { %v376_v3 = vadd.f32 %v375_v2, %v996_v42 }
 0x113   :  { %v523_v4 = vpack.c.bf16 %v471_v0, %v422_v61 }
 0x114   :  { %v492_v5 = vpack.c.bf16 %v376_v3, %v327_v1 }
 0x115   :  { %539 = vst [vmem:[%s1166_s4 + $0x68] sm:$0xff] %v523_v4 }
 0x116   :  { %508 = vst [vmem:[%s1165_s3 + $0x70] sm:$0xff] %v492_v5 }
 0x117   :  { %v424_v6 = vpop.f32.mrf.mxu2 }
 0x118   :  { %v425_v7 = vadd.f32 %v424_v6, %v1000_v48  ;;  %v473_v8 = vpop.f32.mrf.mxu3  ;;  %v328_v9 = vpop.f32.mrf.mxu0 }
 0x119   :  { %v474_v10 = vadd.f32 %v473_v8, %v1002_v49  ;;  %v329_v11 = vadd.f32 %v328_v9, %v994_v41  ;;  %v377_v12 = vpop.f32.mrf.mxu1 }
 0x11a   :  { %v378_v13 = vadd.f32 %v377_v12, %v996_v42 }
 0x11b   :  { %v524_v14 = vpack.c.bf16 %v474_v10, %v425_v7 }
 0x11c   :  { %v493_v15 = vpack.c.bf16 %v378_v13, %v329_v11 }
 0x11d   :  { %540 = vst [vmem:[%s1166_s4 + $0x70] sm:$0xff] %v524_v14 }
 0x11e   :  { %509 = vst [vmem:[%s1165_s3 + $0x78] sm:$0xff] %v493_v15 }
 0x11f   :  { %v426_v16 = vpop.f32.mrf.mxu2 }
 0x120   :  { %v427_v17 = vadd.f32 %v426_v16, %v1000_v48  ;;  %v475_v18 = vpop.f32.mrf.mxu3 }
 0x121   :  { %v476_v19 = vadd.f32 %v475_v18, %v1002_v49 }
 0x123   :  { %v525_v41 = vpack.c.bf16 %v476_v19, %v427_v17 }
 0x125   :  { %541 = vst [vmem:[%s1166_s4 + $0x78] sm:$0xff] %v525_v41 }

// kernel: new_stereo_forward.6
= control target key start
LH: loop header
LB: loop body
LE: loop exit
PB: predicated region body
PF: predicated region fallthrough
CT: control target
= control target key end

     0   :  { %s1263_s12 = smov 0   ;;  %s1265_s13 = smov 0   ;;  %s1512_s0 = inlined_call_operand.vmem [shape: bf16[2,8,8,256], index: 0, kind: input, shape index: {}]   ;;  %s1513_s1 = inlined_call_operand.vmem [shape: bf16[2,8,8,256], index: 1, kind: input, shape index: {}]   ;;  %s1514_s2 = inlined_call_operand.vmem [shape: bf16[2,8,8,8], index: 2, kind: output, shape index: {0}]   ;;  %s1515_s3 = inlined_call_operand.vmem [shape: f32[2,8,1,8], index: 3, kind: output, shape index: {1}]  }
   0x1   :  { %s1267_s14 = smov 0  }
   0x2 LB: > { %s26_s15 = sadd.s32 1, %s1237_s13  ;;  %p1150_p0 = scmp.ge.s32.totalorder %s1241_s14, 1  ;;  %s1241_s14 = sphi %s1267_s14, %s14_s14   ;;  %s1237_s13 = sphi %s1265_s13, %s1525_s13   ;;  %s1233_s12 = sphi %s1263_s12, %s1524_s12  }
   0x3   : > { %p28_p1 = scmp.ge.s32.totalorder %s26_s15, 2  ;;  %p182_p2 = scmp.lt.s32.totalorder %s1241_s14, 3 }
   0x5   : > { %s1527_s15 = smov (%p28_p1, %s26_s15), 0  ;;  %p183_p3 = pnand %p1150_p0, %p182_p2 }
   0x6   : > { %p234_p4 = scmp.lt.s32.totalorder (!%p183_p3), %s1233_s12, 1 }
   0x7   : > { %186 = sbr.rel (%p183_p3) target bundleno = 287 (0x11f), region = 28 }
   0xc   : > { %s1529_s12 = smov (!%p234_p4, %s1233_s12), 1  ;;  %vm661_vm1 = vcmask 64512   ;;  %vm642_vm2 = vcmask 60416   ;;  %vm982_vm5 = vcmask 57344  }
   0xd   : > { %s1160_s16 = sshll.u32 %s1529_s12, 6  ;;  %s1162_s23 = sshll.u32 %s1529_s12, 5 }
   0xe   : > { %s1287_s19 = scalar_lea.vmem %s1512_s0, %s1160_s16  ;;  %s1294_s22 = scalar_lea.vmem %s1513_s1, %s1160_s16 }
   0xf   : > { %v275_v0 = vld [vmem:[%s1287_s19] sm:$0xff]  ;;  %v276_v1 = vld [vmem:[%s1287_s19 + $0x8] sm:$0xff]  ;;  %v278_v8 = vld [vmem:[%s1287_s19 + $0x18] sm:$0xff]  ;;  %s1318_s26 = scalar_lea.vmem %s1514_s2, %s1162_s23  ;;  %s1157_s27 = sshll.u32 %s1529_s12, 3 }
  0x10   : > { %v299_v2 = vunpack.c.l.b16 %v275_v0  ;;  %v300_v3 = vunpack.c.h.b16 %v275_v0  ;;  %v339_v4 = vunpack.c.l.b16 %v276_v1  ;;  %v340_v5 = vunpack.c.h.b16 %v276_v1  ;;  %v283_v6 = vld [vmem:[%s1294_s22] sm:$0xff]  ;;  %v284_v7 = vld [vmem:[%s1294_s22 + $0x8] sm:$0xff]  ;;  %v277_v9 = vld [vmem:[%s1287_s19 + $0x10] sm:$0xff]  ;;  %s1412_s30 = scalar_lea.vmem %s1515_s3, %s1157_s27 }
  0x11   : > { %v292_v14 = vunpack.c.l.b16 %v283_v6  ;;  %v293_v15 = vunpack.c.h.b16 %v283_v6  ;;  %v332_v16 = vunpack.c.l.b16 %v284_v7  ;;  %v333_v17 = vunpack.c.h.b16 %v284_v7  ;;  %v280_v22 = vld [vmem:[%s1287_s19 + $0x28] sm:$0xff]  ;;  %v279_v23 = vld [vmem:[%s1287_s19 + $0x20] sm:$0xff]  ;;  %v285_v40 = vld [vmem:[%s1294_s22 + $0x10] sm:$0xff] }
  0x12   : > { %v301_v10 = vpack.c.b16 %v299_v2, %v299_v2  ;;  %v302_v11 = vpack.c.b16 %v300_v3, %v300_v3  ;;  %v341_v12 = vpack.c.b16 %v339_v4, %v339_v4  ;;  %v342_v13 = vpack.c.b16 %v340_v5, %v340_v5  ;;  %v286_v41 = vld [vmem:[%s1294_s22 + $0x18] sm:$0xff]  ;;  %v281_v45 = vld [vmem:[%s1287_s19 + $0x30] sm:$0xff]  ;;  %v287_v60 = vld [vmem:[%s1294_s22 + $0x20] sm:$0xff] }
  0x13   : > { %v419_v18 = vunpack.c.l.b16 %v278_v8  ;;  %v420_v19 = vunpack.c.h.b16 %v278_v8  ;;  %v379_v20 = vunpack.c.l.b16 %v277_v9  ;;  %v380_v21 = vunpack.c.h.b16 %v277_v9  ;;  %v282_v42 = vld [vmem:[%s1287_s19 + $0x38] sm:$0xff]  ;;  %v288_v61 = vld [vmem:[%s1294_s22 + $0x28] sm:$0xff]  ;;  %v289_v6 = vld [vmem:[%s1294_s22 + $0x30] sm:$0xff] }
  0x14   : > { %312 = vmatpush.bf16.xpose.msra.mxu0 %v301_v10  ;;  %325 = vmatpush.bf16.xpose.msra.mxu1 %v302_v11  ;;  %v294_v28 = vpack.c.b16 %v292_v14, %v292_v14  ;;  %v295_v29 = vpack.c.b16 %v293_v15, %v293_v15  ;;  %v334_v30 = vpack.c.b16 %v332_v16, %v332_v16  ;;  %v499_v32 = vunpack.c.l.b16 %v280_v22  ;;  %v290_v7 = vld [vmem:[%s1294_s22 + $0x38] sm:$0xff] }
  0x15   : > { %352 = vmatpush.bf16.xpose.msra.mxu2 %v341_v12  ;;  %365 = vmatpush.bf16.xpose.msra.mxu3 %v342_v13  ;;  %v421_v24 = vpack.c.b16 %v419_v18, %v419_v18  ;;  %v422_v25 = vpack.c.b16 %v420_v19, %v420_v19  ;;  %v381_v26 = vpack.c.b16 %v379_v20, %v379_v20  ;;  %v500_v33 = vunpack.c.h.b16 %v280_v22 }
  0x16   : > { %v382_v27 = vpack.c.b16 %v380_v21, %v380_v21  ;;  %v335_v31 = vpack.c.b16 %v333_v17, %v333_v17  ;;  %v459_v34 = vunpack.c.l.b16 %v279_v23  ;;  %v460_v35 = vunpack.c.h.b16 %v279_v23 }
  0x17   : > { %v501_v36 = vpack.c.b16 %v499_v32, %v499_v32  ;;  %v502_v37 = vpack.c.b16 %v500_v33, %v500_v33  ;;  %v372_v43 = vunpack.c.l.b16 %v285_v40  ;;  %v373_v44 = vunpack.c.h.b16 %v285_v40 }
  0x18   : > { %v461_v38 = vpack.c.b16 %v459_v34, %v459_v34  ;;  %v462_v39 = vpack.c.b16 %v460_v35, %v460_v35  ;;  %v412_v46 = vunpack.c.l.b16 %v286_v41  ;;  %v413_v47 = vunpack.c.h.b16 %v286_v41 }
  0x19   : > { %v579_v48 = vunpack.c.l.b16 %v282_v42  ;;  %v580_v49 = vunpack.c.h.b16 %v282_v42  ;;  %v539_v50 = vunpack.c.l.b16 %v281_v45  ;;  %v540_v51 = vunpack.c.h.b16 %v281_v45 }
  0x1a   : > { %v374_v52 = vpack.c.b16 %v372_v43, %v372_v43  ;;  %v375_v53 = vpack.c.b16 %v373_v44, %v373_v44  ;;  %v414_v54 = vpack.c.b16 %v412_v46, %v412_v46  ;;  %v415_v55 = vpack.c.b16 %v413_v47, %v413_v47 }
  0x1b   : > { %313 = vmatmul.bf16.vlgmr.msra.gmra.mxu0 %v294_v28  ;;  %326 = vmatmul.bf16.vlgmr.msra.gmra.mxu1 %v295_v29  ;;  %v581_v56 = vpack.c.b16 %v579_v48, %v579_v48  ;;  %v582_v57 = vpack.c.b16 %v580_v49, %v580_v49  ;;  %v541_v58 = vpack.c.b16 %v539_v50, %v539_v50  ;;  %v452_v62 = vunpack.c.l.b16 %v287_v60 }
  0x1c   : > { %392 = vmatpush.bf16.xpose.msrb.mxu0 %v381_v26  ;;  %405 = vmatpush.bf16.xpose.msrb.mxu1 %v382_v27  ;;  %v542_v59 = vpack.c.b16 %v540_v51, %v540_v51  ;;  %v453_v63 = vunpack.c.h.b16 %v287_v60  ;;  %v492_v0 = vunpack.c.l.b16 %v288_v61  ;;  %v493_v1 = vunpack.c.h.b16 %v288_v61 }
  0x1d   : > { %432 = vmatpush.bf16.xpose.msrb.mxu2 %v421_v24  ;;  %445 = vmatpush.bf16.xpose.msrb.mxu3 %v422_v25  ;;  %v454_v2 = vpack.c.b16 %v452_v62, %v452_v62  ;;  %v532_v8 = vunpack.c.l.b16 %v289_v6  ;;  %v533_v9 = vunpack.c.h.b16 %v289_v6  ;;  %v572_v10 = vunpack.c.l.b16 %v290_v7 }
  0x1e   : > { %353 = vmatmul.bf16.vlgmr.msra.gmra.mxu2 %v334_v30  ;;  %366 = vmatmul.bf16.vlgmr.msra.gmra.mxu3 %v335_v31  ;;  %v455_v3 = vpack.c.b16 %v453_v63, %v453_v63  ;;  %v494_v4 = vpack.c.b16 %v492_v0, %v492_v0  ;;  %v495_v5 = vpack.c.b16 %v493_v1, %v493_v1  ;;  %v573_v11 = vunpack.c.h.b16 %v290_v7 }
  0x1f   : > { %v534_v12 = vpack.c.b16 %v532_v8, %v532_v8  ;;  %v535_v13 = vpack.c.b16 %v533_v9, %v533_v9  ;;  %v574_v14 = vpack.c.b16 %v572_v10, %v572_v10  ;;  %v619_v16 = vlaneseq }
  0x20   : > { %v575_v15 = vpack.c.b16 %v573_v11, %v573_v11 }
  0x21   : > { %v620_v17 = vshrl.u32 %v619_v16, 7  ;;  %v622_v18 = vand.u32 127, %v619_v16 }
  0x23   : > { %vm1311_vm0 = vcmp.ge.s32.totalorder %v622_v18, %v620_v17 }
  0x24   : > { %472 = vmatpush.bf16.xpose.msra.mxu0 %v461_v38  ;;  %485 = vmatpush.bf16.xpose.msra.mxu1 %v462_v39 }
  0x25   : > { %512 = vmatpush.bf16.xpose.msra.mxu2 %v501_v36  ;;  %525 = vmatpush.bf16.xpose.msra.mxu3 %v502_v37 }
  0x2b   : > { %393 = vmatmul.bf16.vlgmr.msrb.gmra.mxu0 %v374_v52  ;;  %406 = vmatmul.bf16.vlgmr.msrb.gmra.mxu1 %v375_v53 }
  0x2c   : > { %552 = vmatpush.bf16.xpose.msrb.mxu0 %v541_v58  ;;  %565 = vmatpush.bf16.xpose.msrb.mxu1 %v542_v59  ;;  %v659_v58 = vsub.s32 %v622_v18, %v620_v17 }
  0x2e   : > { %433 = vmatmul.bf16.vlgmr.msrb.gmra.mxu2 %v414_v54  ;;  %446 = vmatmul.bf16.vlgmr.msrb.gmra.mxu3 %v415_v55  ;;  %v1341_v6 = vcvt.s32.f32 %v659_v58 }
  0x2f   : > { %592 = vmatpush.bf16.xpose.msrb.mxu2 %v581_v56  ;;  %605 = vmatpush.bf16.xpose.msrb.mxu3 %v582_v57 }
  0x3b   : > { %473 = vmatmul.bf16.vlgmr.msra.gmra.mxu0 %v454_v2  ;;  %486 = vmatmul.bf16.vlgmr.msra.gmra.mxu1 %v455_v3 }
  0x3e   : > { %513 = vmatmul.bf16.vlgmr.msra.gmra.mxu2 %v494_v4  ;;  %526 = vmatmul.bf16.vlgmr.msra.gmra.mxu3 %v495_v5 }
  0x4b   : > { %553 = vmatmul.bf16.vlgmr.msrb.gmra.mxu0 %v534_v12  ;;  %566 = vmatmul.bf16.vlgmr.msrb.gmra.mxu1 %v535_v13 }
  0x4e   : > { %593 = vmatmul.bf16.vlgmr.msrb.gmra.mxu2 %v574_v14  ;;  %606 = vmatmul.bf16.vlgmr.msrb.gmra.mxu3 %v575_v15 }
  0x98   : > { %v314_v19 = vpop.f32.mrf.mxu0  ;;  %v327_v20 = vpop.f32.mrf.mxu1 }
  0x99   : > { %v328_v21 = vadd.f32 %v327_v20, %v314_v19 }
  0x9b   : > { %v611_v23 = vmul.f32 0.0625, %v328_v21 }
  0x9d   : > { %v626_v24 = vsel %vm1311_vm0, %v611_v23, 0.0  ;;  %v651_v25 = vsel %vm1311_vm0, %v611_v23, -1e+09 }
  0x9e   : > { %v634_v26 = vpack.c.bf16 %v626_v24, %v626_v24  ;;  %v662_v27 = vsel %vm661_vm1, %v651_v25, -inf }
  0x9f   : > { %v663_v28 = vrot.slane %v662_v27, 4 }
  0xa0   : > { %643 = vst.msk [vmem:[%s1318_s26] sm:$0xf] %vm642_vm2, %v634_v26  ;;  %v316_v32 = vpop.f32.mrf.mxu0  ;;  %v329_v33 = vpop.f32.mrf.mxu1 }
  0xa1   : > { %v354_v29 = vpop.f32.mrf.mxu2  ;;  %v367_v30 = vpop.f32.mrf.mxu3  ;;  %v664_v34 = vmax.f32 %v662_v27, %v663_v28 }
  0xa2   : > { %v368_v31 = vadd.f32 %v367_v30, %v354_v29 }
  0xa3   : > { %v665_v36 = vrot.slane %v664_v34, 2 }
  0xa4   : > { %v612_v35 = vmul.f32 0.0625, %v368_v31 }
  0xa5   : > { %v666_v39 = vmax.f32 %v664_v34, %v665_v36 }
  0xa6   : > { %v627_v37 = vsel %vm1311_vm0, %v612_v35, 0.0  ;;  %v652_v38 = vsel %vm1311_vm0, %v612_v35, -1e+09 }
  0xa7   : > { %v635_v40 = vpack.c.bf16 %v627_v37, %v627_v37  ;;  %v669_v41 = vsel %vm661_vm1, %v652_v38, -inf  ;;  %v667_v43 = vrot.slane %v666_v39, 1 }
  0xa8   : > { %v670_v42 = vrot.slane %v669_v41, 4  ;;  %v394_v47 = vpop.f32.mrf.mxu0  ;;  %v407_v48 = vpop.f32.mrf.mxu1 }
  0xa9   : > { %644 = vst.msk [vmem:[%s1318_s26 + $0x4] sm:$0xf] %vm642_vm2, %v635_v40  ;;  %v356_v44 = vpop.f32.mrf.mxu2  ;;  %v369_v45 = vpop.f32.mrf.mxu3  ;;  %v668_v49 = vmax.f32 %v666_v39, %v667_v43  ;;  %v408_v50 = vadd.f32 %v407_v48, %v394_v47 }
  0xaa   : > { %v671_v46 = vmax.f32 %v669_v41, %v670_v42 }
  0xab   : > { %v718_v52 = vsub.f32 %v651_v25, %v668_v49  ;;  %v613_v53 = vmul.f32 0.0625, %v408_v50 }
  0xac   : > { %v672_v51 = vrot.slane %v671_v46, 2 }
  0xad   : > { %v726_v55 = vmul.f32 1.442695, %v718_v52  ;;  %v628_v56 = vsel %vm1311_vm0, %v613_v53, 0.0  ;;  %v653_v57 = vsel %vm1311_vm0, %v613_v53, -1e+09 }
  0xae   : > { %v673_v54 = vmax.f32 %v671_v46, %v672_v51  ;;  %v636_v60 = vpack.c.bf16 %v628_v56, %v628_v56  ;;  %v676_v61 = vsel %vm661_vm1, %v653_v57, -inf }
  0xaf   : > { %1187 = vpow2.f32 %v726_v55  ;;  %v677_v62 = vrot.slane %v676_v61, 4 }
  0xb0   : > { %v674_v59 = vrot.slane %v673_v54, 1  ;;  %645 = vst.msk [vmem:[%s1318_s26 + $0x8] sm:$0xf] %vm642_vm2, %v636_v60  ;;  %v396_v3 = vpop.f32.mrf.mxu0  ;;  %v409_v4 = vpop.f32.mrf.mxu1 }
  0xb1   : > { %v434_v63 = vpop.f32.mrf.mxu2  ;;  %v447_v0 = vpop.f32.mrf.mxu3  ;;  %v678_v5 = vmax.f32 %v676_v61, %v677_v62 }
  0xb2   : > { %v675_v1 = vmax.f32 %v673_v54, %v674_v59  ;;  %v448_v2 = vadd.f32 %v447_v0, %v434_v63 }
  0xb3   : > { %v679_v9 = vrot.slane %v678_v5, 2 }
  0xb4   : > { %v719_v7 = vsub.f32 %v652_v38, %v675_v1  ;;  %v614_v8 = vmul.f32 0.0625, %v448_v2 }
  0xb5   : > { %v1188_v13 = vpop.eup %1187  ;;  %v680_v14 = vmax.f32 %v678_v5, %v679_v9 }
  0xb6   : > { %v728_v10 = vmul.f32 1.442695, %v719_v7  ;;  %v629_v11 = vsel %vm1311_vm0, %v614_v8, 0.0  ;;  %v654_v12 = vsel %vm1311_vm0, %v614_v8, -1e+09  ;;  %v742_v17 = vsel %vm661_vm1, %v1188_v13, 0.0 }
  0xb7   : > { %v637_v15 = vpack.c.bf16 %v629_v11, %v629_v11  ;;  %v683_v16 = vsel %vm661_vm1, %v654_v12, -inf  ;;  %v798_v18 = vmul.f32 %v1188_v13, %v1341_v6  ;;  %v743_v20 = vrot.slane %v742_v17, 4 }
  0xb8   : > { %1189 = vpow2.f32 %v728_v10  ;;  %v684_v19 = vrot.slane %v683_v16, 4  ;;  %v681_v21 = vrot.slane %v680_v14, 1  ;;  %v474_v27 = vpop.f32.mrf.mxu0  ;;  %v487_v28 = vpop.f32.mrf.mxu1 }
  0xb9   : > { %646 = vst.msk [vmem:[%s1318_s26 + $0xc] sm:$0xf] %vm642_vm2, %v637_v15  ;;  %v436_v23 = vpop.f32.mrf.mxu2  ;;  %v449_v24 = vpop.f32.mrf.mxu3  ;;  %v806_v25 = vsel %vm661_vm1, %v798_v18, 0.0  ;;  %v744_v29 = vadd.f32 %v743_v20, %v742_v17  ;;  %v488_v32 = vadd.f32 %v487_v28, %v474_v27 }
  0xba   : > { %v685_v26 = vmax.f32 %v683_v16, %v684_v19  ;;  %v807_v30 = vrot.slane %v806_v25, 4  ;;  %v682_v31 = vmax.f32 %v680_v14, %v681_v21 }
  0xbb   : > { %v745_v34 = vrot.slane %v744_v29, 2  ;;  %v615_v39 = vmul.f32 0.0625, %v488_v32 }
  0xbc   : > { %v686_v33 = vrot.slane %v685_v26, 2  ;;  %v808_v35 = vadd.f32 %v807_v30, %v806_v25  ;;  %v720_v36 = vsub.f32 %v653_v57, %v682_v31 }
  0xbd   : > { %v746_v40 = vadd.f32 %v745_v34, %v744_v29  ;;  %v630_v47 = vsel %vm1311_vm0, %v615_v39, 0.0  ;;  %v1364_v60 = vsel %vm1311_vm0, %v615_v39, -1e+09 }
  0xbe   : > { %v1190_v37 = vpop.eup %1189  ;;  %v687_v38 = vmax.f32 %v685_v26, %v686_v33  ;;  %v809_v41 = vrot.slane %v808_v35, 2  ;;  %v730_v45 = vmul.f32 1.442695, %v720_v36  ;;  %v638_v50 = vpack.c.bf16 %v630_v47, %v630_v47 }
  0xbf   : > { %v749_v42 = vsel %vm661_vm1, %v1190_v37, 0.0  ;;  %v799_v43 = vmul.f32 %v1190_v37, %v1341_v6  ;;  %v747_v48 = vrot.slane %v746_v40, 1  ;;  %v690_v1 = vsel %vm661_vm1, %v1364_v60, -inf }
  0xc0   : > { %v750_v44 = vrot.slane %v749_v42, 4  ;;  %v688_v46 = vrot.slane %v687_v38, 1  ;;  %1191 = vpow2.f32 %v730_v45  ;;  %v476_v56 = vpop.f32.mrf.mxu0  ;;  %v489_v57 = vpop.f32.mrf.mxu1  ;;  %v810_v59 = vadd.f32 %v809_v41, %v808_v35  ;;  %647 = vst.msk [vmem:[%s1318_s26 + $0x10] sm:$0xf] %vm642_vm2, %v638_v50 }
  0xc1   : > { %v813_v49 = vsel %vm661_vm1, %v799_v43, 0.0  ;;  %v514_v51 = vpop.f32.mrf.mxu2  ;;  %v527_v52 = vpop.f32.mrf.mxu3  ;;  %v1358_v58 = vadd.f32 %v747_v48, %v746_v40  ;;  %v691_v8 = vrot.slane %v690_v1, 4 }
  0xc2   : > { %v751_v53 = vadd.f32 %v750_v44, %v749_v42  ;;  %v814_v54 = vrot.slane %v813_v49, 4  ;;  %v689_v55 = vmax.f32 %v687_v38, %v688_v46  ;;  %v528_v61 = vadd.f32 %v527_v52, %v514_v51 }
  0xc3   : > { %1193 = vrcp.f32 %v1358_v58  ;;  %v811_v5 = vrot.slane %v810_v59, 1  ;;  %v871_v7 = vand.u32 2147483647, %v1358_v58  ;;  %v873_v11 = vand.u32 2147483648, %v1358_v58 }
  0xc4   : > { %v752_v62 = vrot.slane %v751_v53, 2  ;;  %v815_v63 = vadd.f32 %v814_v54, %v813_v49  ;;  %v721_v0 = vsub.f32 %v654_v12, %v689_v55  ;;  %v616_v9 = vmul.f32 0.0625, %v528_v61 }
  0xc5   : > { %v692_v16 = vmax.f32 %v690_v1, %v691_v8  ;;  %v812_v30 = vadd.f32 %v811_v5, %v810_v59  ;;  %vm867_vm3 = vweird.f32 %v1358_v58  ;;  %vm1383_vm4 = vcmp.eq.f32.partialorder %v871_v7, 8.507059e+37 }
  0xc6   : > { %v753_v2 = vadd.f32 %v752_v62, %v751_v53  ;;  %v816_v3 = vrot.slane %v815_v63, 2  ;;  %v732_v4 = vmul.f32 1.442695, %v721_v0  ;;  %v1192_v10 = vpop.eup %1191  ;;  %v631_v17 = vsel %vm1311_vm0, %v616_v9, 0.0 }
  0xc7   : > { %v756_v12 = vsel %vm661_vm1, %v1192_v10, 0.0  ;;  %v800_v15 = vmul.f32 %v1192_v10, %v1341_v6  ;;  %v639_v23 = vpack.c.bf16 %v631_v17, %v631_v17  ;;  %v693_v29 = vrot.slane %v692_v16, 2 }
  0xc8   : > { %v754_v13 = vrot.slane %v753_v2, 1  ;;  %v817_v14 = vadd.f32 %v816_v3, %v815_v63  ;;  %1195 = vpow2.f32 %v732_v4  ;;  %v757_v21 = vrot.slane %v756_v12, 4  ;;  %v554_v24 = vpop.f32.mrf.mxu0  ;;  %v567_v25 = vpop.f32.mrf.mxu1 }
  0xc9   : > { %v516_v18 = vpop.f32.mrf.mxu2  ;;  %v529_v19 = vpop.f32.mrf.mxu3  ;;  %v820_v28 = vsel %vm661_vm1, %v800_v15, 0.0  ;;  %648 = vst.msk [vmem:[%s1318_s26 + $0x14] sm:$0xf] %vm642_vm2, %v639_v23  ;;  %v874_v33 = vor.u32 1.1754944e-38, %v873_v11  ;;  %v1389_v35 = vsel %vm1311_vm0, %v616_v9, -1e+09  ;;  %v694_v39 = vmax.f32 %v692_v16, %v693_v29 }
  0xca   : > { %v1375_v20 = vadd.f32 %v754_v13, %v753_v2  ;;  %v1194_v26 = vpop.eup %1193  ;;  %v818_v27 = vrot.slane %v817_v14, 1  ;;  %v758_v34 = vadd.f32 %v757_v21, %v756_v12  ;;  %v821_v38 = vrot.slane %v820_v28, 4 }
  0xcb   : > { %v863_v31 = vmul.f32 %v1194_v26, %v1358_v58  ;;  %v568_v40 = vadd.f32 %v567_v25, %v554_v24  ;;  %vm868_vm6 = vweird.f32 %v1194_v26  ;;  %v695_v50 = vrot.slane %v694_v39, 1 }
  0xcc   : > { %1197 = vrcp.f32 %v1375_v20  ;;  %v1391_v41 = vadd.f32 %v818_v27, %v817_v14  ;;  %v759_v42 = vrot.slane %v758_v34, 2  ;;  %v822_v45 = vadd.f32 %v821_v38, %v820_v28  ;;  %vm869_vm7 = vmor %vm867_vm3, %vm868_vm6 }
  0xcd   : > { %v864_v37 = vsub.f32 1.0, %v863_v31  ;;  %v886_v48 = vand.u32 2147483647, %v1375_v20  ;;  %v697_v51 = vsel %vm661_vm1, %v1389_v35, -inf  ;;  %v888_v0 = vand.u32 2147483648, %v1375_v20 }
  0xce   : > { %v1196_v36 = vpop.eup %1195  ;;  %v760_v49 = vadd.f32 %v759_v42, %v758_v34  ;;  %v823_v56 = vrot.slane %v822_v45, 2  ;;  %v696_v5 = vmax.f32 %v694_v39, %v695_v50  ;;  %v698_v7 = vrot.slane %v697_v51, 4 }
  0xcf   : > { %v763_v43 = vsel %vm661_vm1, %v1196_v36, 0.0  ;;  %v865_v44 = vmul.f32 %v1194_v26, %v864_v37  ;;  %v801_v47 = vmul.f32 %v1196_v36, %v1341_v6  ;;  %vm882_vm8 = vweird.f32 %v1375_v20 }
  0xd0   : > { %v764_v46 = vrot.slane %v763_v43, 4  ;;  %v556_v61 = vpop.f32.mrf.mxu0  ;;  %v569_v62 = vpop.f32.mrf.mxu1  ;;  %v761_v1 = vrot.slane %v760_v49, 1  ;;  %v824_v13 = vadd.f32 %v823_v56, %v822_v45  ;;  %v722_v12 = vsub.f32 %v1364_v60, %v696_v5 }
  0xd1   : > { %v1398_v52 = vpop.f32.mrf.mxu2  ;;  %v1400_v53 = vpop.f32.mrf.mxu3  ;;  %v866_v55 = vadd.f32 %v1194_v26, %v865_v44  ;;  %v827_v59 = vsel %vm661_vm1, %v801_v47, 0.0  ;;  %vm1423_vm10 = vcmp.eq.f32.partialorder %v886_v48, 8.507059e+37  ;;  %v889_v17 = vor.u32 1.1754944e-38, %v888_v0 }
  0xd2   : > { %v1198_v54 = vpop.eup %1197  ;;  %v765_v57 = vadd.f32 %v764_v46, %v763_v43  ;;  %v828_v2 = vrot.slane %v827_v59, 4  ;;  %v1416_v9 = vadd.f32 %v761_v1, %v760_v49  ;;  %v617_v19 = vmul.f32 0.0625, %v568_v40 }
  0xd3   : > { %v878_v63 = vmul.f32 %v1198_v54, %v1375_v20  ;;  %v870_v3 = vsel %vm869_vm7, %v1194_v26, %v866_v55  ;;  %vm883_vm9 = vweird.f32 %v1198_v54  ;;  %v734_v24 = vmul.f32 1.442695, %v722_v12 }
  0xd4   : > { %v766_v4 = vrot.slane %v765_v57, 2  ;;  %v875_v58 = vsel %vm1383_vm4, %v874_v33, %v870_v3  ;;  %v829_v10 = vadd.f32 %v828_v2, %v827_v59  ;;  %1199 = vrcp.f32 %v1416_v9  ;;  %vm884_vm11 = vmor %vm882_vm8, %vm883_vm9 }
  0xd5   : > { %v879_v8 = vsub.f32 1.0, %v878_v63  ;;  %v876_v11 = vmul.f32 %v875_v58, %v812_v30  ;;  %v699_v25 = vmax.f32 %v697_v51, %v698_v7  ;;  %v825_v20 = vrot.slane %v824_v13, 1 }
  0xd6   : > { %v767_v14 = vadd.f32 %v766_v4, %v765_v57  ;;  %v830_v23 = vrot.slane %v829_v10, 2  ;;  %v901_v27 = vand.u32 2147483647, %v1416_v9  ;;  %v632_v29 = vsel %vm1311_vm0, %v617_v19, 0.0 }
  0xd7   : > { %v880_v15 = vmul.f32 %v1198_v54, %v879_v8  ;;  %983 = vst.msk [vmem:[%s1412_s30] sm:$0x1] %vm982_vm5, %v876_v11  ;;  %1201 = vpow2.f32 %v734_v24  ;;  %v700_v31 = vrot.slane %v699_v25, 2  ;;  %v640_v32 = vpack.c.bf16 %v632_v29, %v632_v29 }
  0xd8   : > { %v768_v18 = vrot.slane %v767_v14, 1  ;;  %v903_v34 = vand.u32 2147483648, %v1416_v9  ;;  %v831_v38 = vadd.f32 %v830_v23, %v829_v10  ;;  %vm897_vm12 = vweird.f32 %v1416_v9 }
  0xd9   : > { %v881_v21 = vadd.f32 %v1198_v54, %v880_v15  ;;  %v596_v60 = vpop.f32.mrf.mxu2  ;;  %v609_v26 = vpop.f32.mrf.mxu3  ;;  %v701_v39 = vmax.f32 %v699_v25, %v700_v31  ;;  %649 = vst.msk [vmem:[%s1318_s26 + $0x18] sm:$0xf] %vm642_vm2, %v640_v32  ;;  %v1443_v42 = vsel %vm1311_vm0, %v617_v19, -1e+09  ;;  %v826_v43 = vadd.f32 %v825_v20, %v824_v13 }
  0xda   : > { %v1428_v28 = vadd.f32 %v768_v18, %v767_v14  ;;  %v1200_v36 = vpop.eup %1199  ;;  %vm1447_vm13 = vcmp.eq.f32.partialorder %v901_v27, 8.507059e+37  ;;  %v704_v45 = vsel %vm661_vm1, %v1443_v42, -inf  ;;  %v904_v47 = vor.u32 1.1754944e-38, %v903_v34 }
  0xdb   : > { %v885_v30 = vsel %vm884_vm11, %v1198_v54, %v881_v21  ;;  %v893_v40 = vmul.f32 %v1200_v36, %v1416_v9  ;;  %v705_v48 = vrot.slane %v704_v45, 4  ;;  %v608_v49 = vadd.f32 %v1400_v53, %v1398_v52 }
  0xdc   : > { %v890_v33 = vsel %vm1423_vm10, %v889_v17, %v885_v30  ;;  %1203 = vrcp.f32 %v1428_v28  ;;  %vm898_vm14 = vweird.f32 %v1200_v36  ;;  %v832_v51 = vrot.slane %v831_v38, 1 }
  0xdd   : > { %v891_v37 = vmul.f32 %v890_v33, %v1391_v41  ;;  %v702_v41 = vrot.slane %v701_v39, 1  ;;  %v894_v46 = vsub.f32 1.0, %v893_v40  ;;  %v1202_v50 = vpop.eup %1201  ;;  %vm912_vm15 = vweird.f32 %v1428_v28  ;;  %vm899_vm3 = vmor %vm897_vm12, %vm898_vm14 }
  0xde   : > { %v770_v57 = vsel %vm661_vm1, %v1202_v50, 0.0  ;;  %v802_v59 = vmul.f32 %v1202_v50, %v1341_v6  ;;  %v706_v61 = vmax.f32 %v704_v45, %v705_v48  ;;  %v916_v63 = vand.u32 2147483647, %v1428_v28 }
  0xdf   : > { %984 = vst.msk [vmem:[%s1412_s30 + $0x1] sm:$0x1] %vm982_vm5, %v891_v37  ;;  %v703_v54 = vmax.f32 %v701_v39, %v702_v41  ;;  %v895_v56 = vmul.f32 %v1200_v36, %v894_v46  ;;  %v771_v0 = vrot.slane %v770_v57, 4  ;;  %v918_v1 = vand.u32 2147483648, %v1428_v28 }
  0xe0   : > { %v707_v2 = vrot.slane %v706_v61, 2  ;;  %v618_v3 = vmul.f32 0.0625, %v608_v49  ;;  %v834_v7 = vsel %vm661_vm1, %v802_v59, 0.0  ;;  %v833_v25 = vadd.f32 %v832_v51, %v831_v38 }
  0xe1   : > { %v723_v52 = vsub.f32 %v1389_v35, %v703_v54  ;;  %v896_v53 = vadd.f32 %v1200_v36, %v895_v56  ;;  %v772_v5 = vadd.f32 %v771_v0, %v770_v57  ;;  %v835_v19 = vrot.slane %v834_v7, 4 }
  0xe2   : > { %v1204_v55 = vpop.eup %1203  ;;  %v708_v10 = vmax.f32 %v706_v61, %v707_v2  ;;  %v633_v35 = vsel %vm1311_vm0, %v618_v3, 0.0  ;;  %v1470_v11 = vsel %vm1311_vm0, %v618_v3, -1e+09  ;;  %v919_v22 = vor.u32 1.1754944e-38, %v918_v1 }
  0xe3   : > { %v908_v62 = vmul.f32 %v1204_v55, %v1428_v28  ;;  %v736_v58 = vmul.f32 1.442695, %v723_v52  ;;  %v900_v8 = vsel %vm899_vm3, %v1200_v36, %v896_v53  ;;  %vm913_vm4 = vweird.f32 %v1204_v55 }
  0xe4   : > { %v905_v13 = vsel %vm1447_vm13, %v904_v47, %v900_v8  ;;  %v773_v14 = vrot.slane %v772_v5, 2  ;;  %v709_v15 = vrot.slane %v708_v10, 1  ;;  %v641_v16 = vpack.c.bf16 %v633_v35, %v633_v35  ;;  %vm914_vm0 = vmor %vm912_vm15, %vm913_vm4 }
  0xe5   : > { %v909_v4 = vsub.f32 1.0, %v908_v62  ;;  %v906_v12 = vmul.f32 %v905_v13, %v826_v43  ;;  %1205 = vpow2.f32 %v736_v58  ;;  %v711_v21 = vsel %vm661_vm1, %v1470_v11, -inf }
  0xe6   : > { %v774_v18 = vadd.f32 %v773_v14, %v772_v5  ;;  %v710_v23 = vmax.f32 %v708_v10, %v709_v15  ;;  %v712_v24 = vrot.slane %v711_v21, 4  ;;  %vm917_vm6 = vcmp.eq.f32.partialorder %v916_v63, 8.507059e+37  ;;  %650 = vst.msk [vmem:[%s1318_s26 + $0x1c] sm:$0xf] %vm642_vm2, %v641_v16 }
  0xe7   : > { %v910_v9 = vmul.f32 %v1204_v55, %v909_v4  ;;  %985 = vst.msk [vmem:[%s1412_s30 + $0x2] sm:$0x1] %vm982_vm5, %v906_v12  ;;  %v836_v32 = vadd.f32 %v835_v19, %v834_v7 }
  0xe8   : > { %v775_v26 = vrot.slane %v774_v18, 1  ;;  %v724_v27 = vsub.f32 %v1443_v42, %v710_v23  ;;  %v713_v29 = vmax.f32 %v711_v21, %v712_v24 }
  0xe9   : > { %v911_v17 = vadd.f32 %v1204_v55, %v910_v9  ;;  %v837_v37 = vrot.slane %v836_v32, 2 }
  0xea   : > { %v776_v31 = vadd.f32 %v775_v26, %v774_v18  ;;  %v738_v28 = vmul.f32 1.442695, %v724_v27  ;;  %v714_v34 = vrot.slane %v713_v29, 2 }
  0xeb   : > { %v915_v60 = vsel %vm914_vm0, %v1204_v55, %v911_v17  ;;  %v1206_v33 = vpop.eup %1205  ;;  %v838_v41 = vadd.f32 %v837_v37, %v836_v32 }
  0xec   : > { %v920_v20 = vsel %vm917_vm6, %v919_v22, %v915_v60  ;;  %1207 = vrcp.f32 %v776_v31  ;;  %v777_v36 = vsel %vm661_vm1, %v1206_v33, 0.0  ;;  %v803_v39 = vmul.f32 %v1206_v33, %v1341_v6 }
  0xed   : > { %v921_v30 = vmul.f32 %v920_v20, %v833_v25  ;;  %1209 = vpow2.f32 %v738_v28  ;;  %v778_v38 = vrot.slane %v777_v36, 4  ;;  %v715_v40 = vmax.f32 %v713_v29, %v714_v34 }
  0xee   : > { %v841_v46 = vsel %vm661_vm1, %v803_v39, 0.0  ;;  %v839_v61 = vrot.slane %v838_v41, 1  ;;  %v931_v62 = vand.u32 2147483647, %v776_v31  ;;  %v933_v63 = vand.u32 2147483648, %v776_v31 }
  0xef   : > { %986 = vst.msk [vmem:[%s1412_s30 + $0x3] sm:$0x1] %vm982_vm5, %v921_v30  ;;  %v779_v43 = vadd.f32 %v778_v38, %v777_v36  ;;  %v716_v42 = vrot.slane %v715_v40, 1  ;;  %v842_v56 = vrot.slane %v841_v46, 4  ;;  %vm927_vm7 = vweird.f32 %v776_v31 }
  0xf0   : > { %v840_v58 = vadd.f32 %v839_v61, %v838_v41  ;;  %v934_v8 = vor.u32 1.1754944e-38, %v933_v63  ;;  %vm932_vm9 = vcmp.eq.f32.partialorder %v931_v62, 8.507059e+37 }
  0xf1   : > { %v780_v45 = vrot.slane %v779_v43, 2  ;;  %v717_v47 = vmax.f32 %v715_v40, %v716_v42  ;;  %v843_v5 = vadd.f32 %v842_v56, %v841_v46 }
  0xf2   : > { %v1208_v44 = vpop.eup %1207 }
  0xf3   : > { %v1210_v48 = vpop.eup %1209  ;;  %v923_v49 = vmul.f32 %v1208_v44, %v776_v31  ;;  %v781_v50 = vadd.f32 %v780_v45, %v779_v43  ;;  %v725_v59 = vsub.f32 %v1470_v11, %v717_v47  ;;  %vm928_vm2 = vweird.f32 %v1208_v44 }
  0xf4   : > { %v784_v51 = vsel %vm661_vm1, %v1210_v48, 0.0  ;;  %v804_v54 = vmul.f32 %v1210_v48, %v1341_v6  ;;  %vm929_vm8 = vmor %vm927_vm7, %vm928_vm2  ;;  %v844_v14 = vrot.slane %v843_v5, 2 }
  0xf5   : > { %v924_v55 = vsub.f32 1.0, %v923_v49  ;;  %v785_v57 = vrot.slane %v784_v51, 4  ;;  %v782_v0 = vrot.slane %v781_v50, 1  ;;  %v740_v1 = vmul.f32 1.442695, %v725_v59 }
  0xf6   : > { %v848_v3 = vsel %vm661_vm1, %v804_v54, 0.0  ;;  %v845_v21 = vadd.f32 %v844_v14, %v843_v5 }
  0xf7   : > { %v925_v52 = vmul.f32 %v1208_v44, %v924_v55  ;;  %v786_v53 = vadd.f32 %v785_v57, %v784_v51  ;;  %v783_v2 = vadd.f32 %v782_v0, %v781_v50  ;;  %1211 = vpow2.f32 %v740_v1 }
  0xf8   : > { %v849_v11 = vrot.slane %v848_v3, 4  ;;  %v846_v27 = vrot.slane %v845_v21, 1 }
  0xf9   : > { %v926_v4 = vadd.f32 %v1208_v44, %v925_v52  ;;  %v787_v7 = vrot.slane %v786_v53, 2  ;;  %1213 = vrcp.f32 %v783_v2  ;;  %v948_v26 = vand.u32 2147483648, %v783_v2 }
  0xfa   : > { %v850_v17 = vadd.f32 %v849_v11, %v848_v3  ;;  %v946_v30 = vand.u32 2147483647, %v783_v2  ;;  %vm942_vm11 = vweird.f32 %v783_v2  ;;  %v847_v38 = vadd.f32 %v846_v27, %v845_v21 }
  0xfb   : > { %v930_v10 = vsel %vm929_vm8, %v1208_v44, %v926_v4  ;;  %v788_v35 = vadd.f32 %v787_v7, %v786_v53  ;;  %v949_v36 = vor.u32 1.1754944e-38, %v948_v26 }
  0xfc   : > { %v935_v13 = vsel %vm932_vm9, %v934_v8, %v930_v10  ;;  %v851_v60 = vrot.slane %v850_v17, 2  ;;  %vm947_vm13 = vcmp.eq.f32.partialorder %v946_v30, 8.507059e+37 }
  0xfd   : > { %v936_v9 = vmul.f32 %v935_v13, %v840_v58  ;;  %v789_v12 = vrot.slane %v788_v35, 1  ;;  %v1212_v15 = vpop.eup %1211 }
  0xfe   : > { %v791_v19 = vsel %vm661_vm1, %v1212_v15, 0.0  ;;  %v805_v24 = vmul.f32 %v1212_v15, %v1341_v6  ;;  %v852_v34 = vadd.f32 %v851_v60, %v850_v17 }
  0xff   : > { %987 = vst.msk [vmem:[%s1412_s30 + $0x4] sm:$0x1] %vm982_vm5, %v936_v9  ;;  %v790_v16 = vadd.f32 %v789_v12, %v788_v35  ;;  %v1214_v18 = vpop.eup %1213  ;;  %v792_v23 = vrot.slane %v791_v19, 4 }
 0x100   : > { %v938_v22 = vmul.f32 %v1214_v18, %v783_v2  ;;  %vm943_vm10 = vweird.f32 %v1214_v18  ;;  %v855_v32 = vsel %vm661_vm1, %v805_v24, 0.0  ;;  %v853_v45 = vrot.slane %v852_v34, 1 }
 0x101   : > { %1215 = vrcp.f32 %v790_v16  ;;  %v793_v20 = vadd.f32 %v792_v23, %v791_v19  ;;  %vm944_vm12 = vmor %vm942_vm11, %vm943_vm10  ;;  %v856_v40 = vrot.slane %v855_v32, 4  ;;  %v963_v46 = vand.u32 2147483648, %v790_v16 }
 0x102   : > { %v939_v25 = vsub.f32 1.0, %v938_v22  ;;  %v961_v48 = vand.u32 2147483647, %v790_v16  ;;  %vm957_vm14 = vweird.f32 %v790_v16  ;;  %v854_v55 = vadd.f32 %v853_v45, %v852_v34 }
 0x103   : > { %v794_v31 = vrot.slane %v793_v20, 2  ;;  %v857_v50 = vadd.f32 %v856_v40, %v855_v32  ;;  %v964_v54 = vor.u32 1.1754944e-38, %v963_v46 }
 0x104   : > { %v940_v29 = vmul.f32 %v1214_v18, %v939_v25  ;;  %vm962_vm3 = vcmp.eq.f32.partialorder %v961_v48, 8.507059e+37 }
 0x105   : > { %v795_v6 = vadd.f32 %v794_v31, %v793_v20  ;;  %v858_v59 = vrot.slane %v857_v50, 2 }
 0x106   : > { %v941_v28 = vadd.f32 %v1214_v18, %v940_v29 }
 0x107   : > { %v1216_v33 = vpop.eup %1215  ;;  %v796_v44 = vrot.slane %v795_v6, 1  ;;  %v859_v63 = vadd.f32 %v858_v59, %v857_v50 }
 0x108   : > { %v953_v37 = vmul.f32 %v1216_v33, %v790_v16  ;;  %v945_v39 = vsel %vm944_vm12, %v1214_v18, %v941_v28  ;;  %vm958_vm1 = vweird.f32 %v1216_v33 }
 0x109   : > { %v950_v43 = vsel %vm947_vm13, %v949_v36, %v945_v39  ;;  %v797_v49 = vadd.f32 %v796_v44, %v795_v6  ;;  %vm959_vm15 = vmor %vm957_vm14, %vm958_vm1  ;;  %v860_v1 = vrot.slane %v859_v63, 1 }
 0x10a   : > { %v954_v42 = vsub.f32 1.0, %v953_v37  ;;  %v951_v41 = vmul.f32 %v950_v43, %v847_v38 }
 0x10b   : > { %1217 = vrcp.f32 %v797_v49  ;;  %v978_v53 = vand.u32 2147483648, %v797_v49  ;;  %v976_v3 = vand.u32 2147483647, %v797_v49  ;;  %vm972_vm0 = vweird.f32 %v797_v49 }
 0x10c   : > { %v955_v47 = vmul.f32 %v1216_v33, %v954_v42  ;;  %988 = vst.msk [vmem:[%s1412_s30 + $0x5] sm:$0x1] %vm982_vm5, %v951_v41  ;;  %v861_v7 = vadd.f32 %v860_v1, %v859_v63 }
 0x10d   : > { %v979_v5 = vor.u32 1.1754944e-38, %v978_v53  ;;  %vm977_vm2 = vcmp.eq.f32.partialorder %v976_v3, 8.507059e+37 }
 0x10e   : > { %v956_v51 = vadd.f32 %v1216_v33, %v955_v47 }
 0x110   : > { %v960_v56 = vsel %vm959_vm15, %v1216_v33, %v956_v51 }
 0x111   : > { %v965_v57 = vsel %vm962_vm3, %v964_v54, %v960_v56  ;;  %v1218_v62 = vpop.eup %1217 }
 0x112   : > { %v966_v61 = vmul.f32 %v965_v57, %v854_v55  ;;  %v968_v0 = vmul.f32 %v1218_v62, %v797_v49  ;;  %vm973_vm4 = vweird.f32 %v1218_v62 }
 0x113   : > { %vm974_vm6 = vmor %vm972_vm0, %vm973_vm4 }
 0x114   : > { %989 = vst.msk [vmem:[%s1412_s30 + $0x6] sm:$0x1] %vm982_vm5, %v966_v61  ;;  %v969_v52 = vsub.f32 1.0, %v968_v0 }
 0x116   : > { %v970_v2 = vmul.f32 %v1218_v62, %v969_v52 }
 0x118   : > { %v971_v4 = vadd.f32 %v1218_v62, %v970_v2 }
 0x11a   : > { %v975_v58 = vsel %vm974_vm6, %v1218_v62, %v971_v4 }
 0x11b   : > { %v980_v8 = vsel %vm977_vm2, %v979_v5, %v975_v58 }
 0x11c   : > { %v981_v10 = vmul.f32 %v980_v8, %v861_v7 }
 0x11e   : > { %990 = vst.msk [vmem:[%s1412_s30 + $0x7] sm:$0x1] %vm982_vm5, %v981_v10 }
 0x11f PF: > { %s14_s14 = sadd.s32 1, %s1241_s14   ;;  %s1524_s12 = smov %s1237_s13 }
 0x120   : > { %p11_p5 = scmp.ge.s32.totalorder %s14_s14, 4   ;;  %s1525_s13 = smov %s1527_s15 }
 0x122   :  { %13 = sbr.rel (!%p11_p5) target bundleno = 2 (0x2), region = 73 }

// kernel: new_stereo_forward.7
= control target key start
LH: loop header
LB: loop body
LE: loop exit
PB: predicated region body
PF: predicated region fallthrough
CT: control target
= control target key end

     0   :  { %s517_s9 = smov 0   ;;  %s519_s10 = smov 0   ;;  %s569_s0 = inlined_call_operand.vmem [shape: f32[2,9,8,128], index: 0, kind: input, shape index: {}]   ;;  %s570_s1 = inlined_call_operand.vmem [shape: bf16[2,9,8,128], index: 1, kind: input, shape index: {}]   ;;  %s571_s2 = inlined_call_operand.vmem [shape: f32[2,8,128], index: 2, kind: output, shape index: {}]  }
   0x1   :  { %s521_s11 = smov 0  }
   0x2 LB: > { %s24_s12 = sadd.s32 1, %s496_s10  ;;  %p407_p0 = scmp.ge.s32.totalorder %s500_s11, 1  ;;  %s500_s11 = sphi %s521_s11, %s12_s11   ;;  %s496_s10 = sphi %s519_s10, %s573_s10   ;;  %s492_s9 = sphi %s517_s9, %s572_s9  }
   0x3   : > { %p26_p1 = scmp.ge.s32.totalorder %s24_s12, 2  ;;  %p146_p2 = scmp.lt.s32.totalorder %s500_s11, 3 }
   0x5   : > { %s575_s12 = smov (%p26_p1, %s24_s12), 0  ;;  %p147_p3 = pnand %p407_p0, %p146_p2 }
   0x6   : > { %p181_p4 = scmp.lt.s32.totalorder (!%p147_p3), %s492_s9, 1 }
   0x7   : > { %150 = sbr.rel (%p147_p3) target bundleno = 76 (0x4c), region = 28 }
   0xc   : > { %s577_s9 = smov (!%p181_p4, %s492_s9), 1 }
   0xd   : > { %s433_s13 = smul.u32 36, %s577_s9  ;;  %s410_s21 = sshll.u32 %s577_s9, 3 }
   0xe   : > { %s432_s17 = smul.u32 72, %s577_s9  ;;  %s203_s24 = scalar_lea.vmem %s571_s2, %s410_s21 }
   0xf   : > { %s196_s16 = scalar_lea.vmem %s570_s1, %s433_s13 }
  0x10   : > { %v414_v0 = vld [vmem:[%s196_s16] sm:$0xff]   ;;  %v429_v1 = vld [vmem:[%s196_s16 + $0x8] sm:$0xff]   ;;  %v430_v2 = vld [vmem:[%s196_s16 + $0x10] sm:$0xff]   ;;  %s545_s20 = scalar_lea.vmem %s569_s0, %s432_s17 }
  0x11   : > { %v415_v3 = vunpack.c.l.bf16 %v414_v0  ;;  %v416_v4 = vunpack.c.h.bf16 %v414_v0  ;;  %v419_v5 = vunpack.c.l.bf16 %v429_v1  ;;  %v420_v6 = vunpack.c.h.bf16 %v429_v1  ;;  %v431_v7 = vld [vmem:[%s196_s16 + $0x18] sm:$0xff]   ;;  %v212_v8 = vld [vmem:[%s196_s16 + $0x20] sm:$0xf]  ;;  %v223_v37 = vld [vmem:[%s545_s20 + $0x8] sm:$0xff] }
  0x12   : > { %v423_v9 = vunpack.c.l.bf16 %v430_v2  ;;  %v424_v10 = vunpack.c.h.bf16 %v430_v2  ;;  %v427_v11 = vunpack.c.l.bf16 %v431_v7  ;;  %v428_v12 = vunpack.c.h.bf16 %v431_v7  ;;  %v222_v36 = vld [vmem:[%s545_s20] sm:$0xff]  ;;  %v224_v41 = vld [vmem:[%s545_s20 + $0x10] sm:$0xff]  ;;  %v225_v43 = vld [vmem:[%s545_s20 + $0x18] sm:$0xff] }
  0x13   : > { %v221_v13 = vunpack.c.l.bf16 %v212_v8  ;;  %v226_v50 = vld [vmem:[%s545_s20 + $0x20] sm:$0xff]  ;;  %v227_v61 = vld [vmem:[%s545_s20 + $0x28] sm:$0xff] }
  0x14   : > { %v231_v14 = vmax.f32 %v415_v3, %v423_v9  ;;  %v232_v15 = vmax.f32 %v416_v4, %v424_v10  ;;  %v233_v16 = vmax.f32 %v419_v5, %v427_v11  ;;  %v234_v17 = vmax.f32 %v420_v6, %v428_v12 }
  0x16   : > { %v235_v18 = vmax.f32 %v231_v14, %v221_v13  ;;  %v237_v19 = vmax.f32 %v233_v16, %v234_v17 }
  0x18   : > { %v236_v20 = vmax.f32 %v235_v18, %v232_v15  ;;  %v230_v15 = vld [vmem:[%s545_s20 + $0x40] sm:$0xff] }
  0x1a   : > { %v238_v21 = vmax.f32 %v236_v20, %v237_v19 }
  0x1c   : > { %v239_v22 = vsub.f32 %v415_v3, %v238_v21  ;;  %v240_v23 = vsub.f32 %v416_v4, %v238_v21  ;;  %v241_v24 = vsub.f32 %v419_v5, %v238_v21  ;;  %v242_v25 = vsub.f32 %v420_v6, %v238_v21  ;;  %v228_v5 = vld [vmem:[%s545_s20 + $0x30] sm:$0xff] }
  0x1d   : > { %v243_v26 = vsub.f32 %v423_v9, %v238_v21  ;;  %v244_v30 = vsub.f32 %v424_v10, %v238_v21  ;;  %v245_v32 = vsub.f32 %v427_v11, %v238_v21  ;;  %v246_v34 = vsub.f32 %v428_v12, %v238_v21  ;;  %v229_v11 = vld [vmem:[%s545_s20 + $0x38] sm:$0xff] }
  0x1e   : > { %v248_v27 = vmul.f32 1.442695, %v239_v22  ;;  %v250_v28 = vmul.f32 1.442695, %v240_v23  ;;  %v252_v29 = vmul.f32 1.442695, %v241_v24  ;;  %v247_v38 = vsub.f32 %v221_v13, %v238_v21 }
  0x1f   : > { %v254_v31 = vmul.f32 1.442695, %v242_v25  ;;  %v256_v33 = vmul.f32 1.442695, %v243_v26  ;;  %v258_v35 = vmul.f32 1.442695, %v244_v30 }
  0x20   : > { %458 = vpow2.f32 %v248_v27  ;;  %v260_v39 = vmul.f32 1.442695, %v245_v32  ;;  %v262_v44 = vmul.f32 1.442695, %v246_v34  ;;  %v264_v51 = vmul.f32 1.442695, %v247_v38 }
  0x21   : > { %460 = vpow2.f32 %v250_v28 }
  0x22   : > { %462 = vpow2.f32 %v252_v29 }
  0x23   : > { %464 = vpow2.f32 %v254_v31 }
  0x24   : > { %466 = vpow2.f32 %v256_v33 }
  0x25   : > { %468 = vpow2.f32 %v258_v35 }
  0x26   : > { %v459_v40 = vpop.eup %458  ;;  %470 = vpow2.f32 %v260_v39 }
  0x27   : > { %v461_v42 = vpop.eup %460  ;;  %v274_v45 = vmul.f32 %v459_v40, %v222_v36  ;;  %472 = vpow2.f32 %v262_v44 }
  0x28   : > { %v463_v46 = vpop.eup %462  ;;  %v266_v47 = vadd.f32 %v461_v42, %v459_v40  ;;  %v275_v48 = vmul.f32 %v461_v42, %v223_v37  ;;  %474 = vpow2.f32 %v264_v51 }
  0x29   : > { %v465_v49 = vpop.eup %464  ;;  %v276_v52 = vmul.f32 %v463_v46, %v224_v41 }
  0x2a   : > { %v267_v53 = vadd.f32 %v463_v46, %v266_v47  ;;  %v277_v54 = vmul.f32 %v465_v49, %v225_v43  ;;  %v283_v55 = vadd.f32 %v275_v48, %v274_v45  ;;  %v467_v56 = vpop.eup %466 }
  0x2b   : > { %v278_v58 = vmul.f32 %v467_v56, %v226_v50  ;;  %v469_v60 = vpop.eup %468 }
  0x2c   : > { %v268_v57 = vadd.f32 %v465_v49, %v267_v53  ;;  %v284_v59 = vadd.f32 %v283_v55, %v276_v52  ;;  %v471_v0 = vpop.eup %470  ;;  %v279_v2 = vmul.f32 %v469_v60, %v227_v61 }
  0x2d   : > { %v473_v4 = vpop.eup %472  ;;  %v280_v9 = vmul.f32 %v471_v0, %v228_v5 }
  0x2e   : > { %v269_v62 = vadd.f32 %v467_v56, %v268_v57  ;;  %v285_v63 = vadd.f32 %v284_v59, %v277_v54  ;;  %v475_v7 = vpop.eup %474  ;;  %v281_v13 = vmul.f32 %v473_v4, %v229_v11 }
  0x2f   : > { %v282_v16 = vmul.f32 %v475_v7, %v230_v15 }
  0x30   : > { %v270_v1 = vadd.f32 %v469_v60, %v269_v62  ;;  %v286_v3 = vadd.f32 %v285_v63, %v278_v58 }
  0x32   : > { %v271_v6 = vadd.f32 %v471_v0, %v270_v1  ;;  %v287_v10 = vadd.f32 %v286_v3, %v279_v2 }
  0x34   : > { %v272_v8 = vadd.f32 %v473_v4, %v271_v6  ;;  %v288_v14 = vadd.f32 %v287_v10, %v280_v9 }
  0x36   : > { %v273_v12 = vadd.f32 %v475_v7, %v272_v8  ;;  %v289_v17 = vadd.f32 %v288_v14, %v281_v13 }
  0x38   : > { %476 = vrcp.f32 %v273_v12  ;;  %v290_v20 = vadd.f32 %v289_v17, %v282_v16  ;;  %v303_v21 = vand.u32 2147483648, %v273_v12  ;;  %vm297_vm0 = vweird.f32 %v273_v12 }
  0x39   : > { %v301_v23 = vand.u32 2147483647, %v273_v12 }
  0x3a   : > { %v304_v25 = vor.u32 1.1754944e-38, %v303_v21  ;;  %v291_v26 = vmul.f32 4.0, %v290_v20 }
  0x3b   : > { %vm302_vm3 = vcmp.eq.f32.partialorder %v301_v23, 8.507059e+37 }
  0x3e   : > { %v477_v18 = vpop.eup %476 }
  0x3f   : > { %v293_v19 = vmul.f32 %v477_v18, %v273_v12  ;;  %vm298_vm1 = vweird.f32 %v477_v18 }
  0x40   : > { %vm299_vm2 = vmor %vm297_vm0, %vm298_vm1 }
  0x41   : > { %v294_v22 = vsub.f32 1.0, %v293_v19 }
  0x43   : > { %v295_v24 = vmul.f32 %v477_v18, %v294_v22 }
  0x45   : > { %v296_v27 = vadd.f32 %v477_v18, %v295_v24 }
  0x47   : > { %v300_v28 = vsel %vm299_vm2, %v477_v18, %v296_v27 }
  0x48   : > { %v305_v29 = vsel %vm302_vm3, %v304_v25, %v300_v28 }
  0x49   : > { %v306_v30 = vmul.f32 %v305_v29, %v291_v26 }
  0x4b   : > { %307 = vst [vmem:[%s203_s24] sm:$0xff] %v306_v30 }
  0x4c PF: > { %s12_s11 = sadd.s32 1, %s500_s11   ;;  %s572_s9 = smov %s496_s10 }
  0x4d   : > { %p9_p5 = scmp.ge.s32.totalorder %s12_s11, 4   ;;  %s573_s10 = smov %s575_s12 }
  0x4f   :  { %11 = sbr.rel (!%p9_p5) target bundleno = 2 (0x2), region = 61 }

</bundles_post_ra>
